<compile_context>
chip_gen: v6e
topology: v6e:2x2x1
jax: 0.10.0
libtpu: 0.0.40
codegen_flags: <defaults>
</compile_context>

<pallas_src>
import functools
import math

import jax
import jax.numpy as jnp
from jax import lax
from jax.experimental import pallas as pl
from jax.experimental.pallas import tpu as pltpu

_EPS = 1e-5
# Explicit scoped-VMEM budget (leave headroom; re-derive per chip/tile size).
_VMEM_LIMIT = 64 * 1024 * 1024


# ----------------------------------------------------------------------------
# Shared in-kernel helpers
# ----------------------------------------------------------------------------

def _layer_norm(y, g_ref, b_ref):
  # y is f32 (residual already added by caller); stats stay in f32.
  mu = jnp.mean(y, axis=-1, keepdims=True)
  var = jnp.mean((y - mu) ** 2, axis=-1, keepdims=True)
  return (y - mu) * lax.rsqrt(var + _EPS) * g_ref[...] + b_ref[...]


def _mha(xq, xkv, wq_ref, bq_ref, wkv_ref, bkv_ref, wo_ref, bo_ref,
         num_heads, head_dim):
  """Multi-head attention: bf16 MXU operands, f32 accumulation.

  xq:  [Lq, D] bf16 (queries), xkv: [Lk, D] bf16 (keys/values) -> [Lq, D] f32
  """
  qkv_dim = num_heads * head_dim
  scale = 1.0 / math.sqrt(head_dim)

  q = jnp.dot(xq, wq_ref[...], preferred_element_type=jnp.float32) + bq_ref[...]
  kv = jnp.dot(xkv, wkv_ref[...], preferred_element_type=jnp.float32) + bkv_ref[...]
  # Cast q/k/v to bf16 once (hoisted out of the head loop).
  qb = q.astype(jnp.bfloat16)
  kb = kv[:, :qkv_dim].astype(jnp.bfloat16)
  vb = kv[:, qkv_dim:].astype(jnp.bfloat16)

  head_outs = []
  for h in range(num_heads):
    lo = h * head_dim
    qh = qb[:, lo:lo + head_dim]
    kh = kb[:, lo:lo + head_dim]
    vh = vb[:, lo:lo + head_dim]
    # Contract the head dim directly (no k.T / XLU transpose).
    s = lax.dot_general(qh, kh, (((1,), (1,)), ((), ())),
                        preferred_element_type=jnp.float32) * scale
    s = s - jnp.max(s, axis=-1, keepdims=True)
    p = jnp.exp(s)
    # EUP reciprocal (approx) keeps the softmax normalizer off the VALU.
    p = p * pl.reciprocal(jnp.sum(p, axis=-1, keepdims=True), approx=True)
    head_outs.append(jnp.dot(p.astype(jnp.bfloat16), vh,
                             preferred_element_type=jnp.float32))   # [Lq, Dh]

  # Single output projection with K = qkv_dim (good MXU fill) instead of
  # H small K=head_dim matmuls + VALU accumulation of [Lq, D] partials.
  o_cat = jnp.concatenate(head_outs, axis=-1).astype(jnp.bfloat16)  # [Lq, qkv]
  return (jnp.dot(o_cat, wo_ref[...], preferred_element_type=jnp.float32)
          + bo_ref[...])


# ----------------------------------------------------------------------------
# Pack kernel: mem' = LN(mem + MHA(q=mem, kv=x))       grid = (2B,)
# ----------------------------------------------------------------------------

def _pack_kernel(x_ref, mem_ref,
                 wq_ref, bq_ref, wkv_ref, bkv_ref, wo_ref, bo_ref,
                 lnm_g_ref, lnm_b_ref,
                 mem_out_ref, *, num_heads, head_dim):
  x = x_ref[0]        # [L, D] bf16 (no full-block f32 copy)
  mem = mem_ref[0]    # [M, D] bf16
  packed = _mha(mem, x, wq_ref, bq_ref, wkv_ref, bkv_ref, wo_ref, bo_ref,
                num_heads, head_dim)                          # [M, D] f32
  mem_new = _layer_norm(mem.astype(jnp.float32) + packed, lnm_g_ref, lnm_b_ref)
  mem_out_ref[0] = mem_new.astype(mem_out_ref.dtype)


# ----------------------------------------------------------------------------
# Unpack + FFN kernel: x' = LN(x1 + FFN(x1)), x1 = LN(x + MHA(q=x, kv=mem'))
# grid = (2B, L // l_tile) — row-tiled (softmax is over M, LN is row-local)
# ----------------------------------------------------------------------------

def _unpack_ffn_kernel(x_ref, mem_ref,
                       wq_ref, bq_ref, wkv_ref, bkv_ref, wo_ref, bo_ref,
                       lna_g_ref, lna_b_ref, lnf_g_ref, lnf_b_ref,
                       w1_ref, b1_ref, w2_ref, b2_ref,
                       x_out_ref, *, num_heads, head_dim):
  x = x_ref[0]        # [Lt, D] bf16
  mem = mem_ref[0]    # [M, D] bf16 (already LayerNormed mem')
  unpacked = _mha(x, mem, wq_ref, bq_ref, wkv_ref, bkv_ref, wo_ref, bo_ref,
                  num_heads, head_dim)                        # [Lt, D] f32
  x1 = _layer_norm(x.astype(jnp.float32) + unpacked, lna_g_ref, lna_b_ref)
  # FFN (the [Lt, F] GELU intermediate is the per-tile VMEM hot spot).
  h = jnp.dot(x1.astype(jnp.bfloat16), w1_ref[...],
              preferred_element_type=jnp.float32) + b1_ref[...]
  h = jax.nn.gelu(h)  # tanh approximation; PyTorch nn.GELU default is exact erf
  f = jnp.dot(h.astype(jnp.bfloat16), w2_ref[...],
              preferred_element_type=jnp.float32) + b2_ref[...]
  x2 = _layer_norm(x1 + f, lnf_g_ref, lnf_b_ref)
  x_out_ref[0] = x2.astype(x_out_ref.dtype)


# ----------------------------------------------------------------------------
# Block wrapper
# ----------------------------------------------------------------------------

def _weight_spec(shape):
  # Weight/bias blocks: constant index_map across the grid -> single-buffered.
  n = len(shape)
  return pl.BlockSpec(shape, lambda *_: (0,) * n, pipeline_mode=pl.Buffered(1))


def luna_block(x, mem, p, num_heads, l_tile):
  """x:[2B,L,D] bf16, mem:[2B,M,D] bf16 -> (x_out, mem_out), both bf16."""
  B2, L, D = x.shape
  M = mem.shape[1]
  qkv_dim = p["wq"].shape[1]
  head_dim = qkv_dim // num_heads
  F = p["ffn_w1"].shape[1]

  att_specs = [
      _weight_spec((D, qkv_dim)), _weight_spec((1, qkv_dim)),
      _weight_spec((D, 2 * qkv_dim)), _weight_spec((1, 2 * qkv_dim)),
      _weight_spec((qkv_dim, D)), _weight_spec((1, D)),
  ]

  # --- pack ------------------------------------------------------------------
  pack_kernel = functools.partial(_pack_kernel,
                                  num_heads=num_heads, head_dim=head_dim)
  mem_new = pl.pallas_call(
      pack_kernel,
      grid=(B2,),
      in_specs=[
          pl.BlockSpec((1, L, D), lambda b: (b, 0, 0)),
          pl.BlockSpec((1, M, D), lambda b: (b, 0, 0)),
          *att_specs,
          _weight_spec((1, D)), _weight_spec((1, D)),
      ],
      out_specs=pl.BlockSpec((1, M, D), lambda b: (b, 0, 0)),
      out_shape=jax.ShapeDtypeStruct((B2, M, D), mem.dtype),
      input_output_aliases={1: 0},            # mem rewritten in place
      compiler_params=pltpu.CompilerParams(
          dimension_semantics=("parallel",),
          vmem_limit_bytes=_VMEM_LIMIT),
  )(x, mem,
    p["wq"], p["bq"], p["wkv"], p["bkv"], p["wo"], p["bo"],
    p["ln_mem_g"], p["ln_mem_b"])

  # --- unpack + FFN, row-tiled over L -----------------------------------------
  unpack_kernel = functools.partial(_unpack_ffn_kernel,
                                    num_heads=num_heads, head_dim=head_dim)
  n_lt = L // l_tile
  x_out = pl.pallas_call(
      unpack_kernel,
      grid=(B2, n_lt),
      in_specs=[
          pl.BlockSpec((1, l_tile, D), lambda b, lt: (b, lt, 0)),
          pl.BlockSpec((1, M, D), lambda b, lt: (b, 0, 0)),
          *att_specs,
          _weight_spec((1, D)), _weight_spec((1, D)),
          _weight_spec((1, D)), _weight_spec((1, D)),
          _weight_spec((D, F)), _weight_spec((1, F)),
          _weight_spec((F, D)), _weight_spec((1, D)),
      ],
      out_specs=pl.BlockSpec((1, l_tile, D), lambda b, lt: (b, lt, 0)),
      out_shape=jax.ShapeDtypeStruct((B2, L, D), x.dtype),
      input_output_aliases={0: 0},            # x rewritten in place
      compiler_params=pltpu.CompilerParams(
          dimension_semantics=("parallel", "parallel"),
          vmem_limit_bytes=_VMEM_LIMIT),
  )(x, mem_new,
    p["wq"], p["bq"], p["wkv"], p["bkv"], p["wo"], p["bo"],
    p["ln_att_g"], p["ln_att_b"], p["ln_ffn_g"], p["ln_ffn_b"],
    p["ffn_w1"], p["ffn_b1"], p["ffn_w2"], p["ffn_b2"])
  return x_out, mem_new


# ----------------------------------------------------------------------------
# Dual classifier: gridded over B, fused matching head
# ----------------------------------------------------------------------------

def _dual_classifier_kernel(e1_ref, e2_ref, w_ref, b_ref, o_ref):
  # TODO(synk): DualClassifier source unavailable; modeled as the standard LRA
  # matching head: mean-pool, features [h1, h2, h1*h2, h1-h2], linear.
  # TODO(synk): at realistic L, tile the mean-pool over L with an f32 accumulator.
  e1 = e1_ref[0].astype(jnp.float32)                 # [L, D]
  e2 = e2_ref[0].astype(jnp.float32)
  h1 = jnp.mean(e1, axis=0, keepdims=True)           # [1, D]
  h2 = jnp.mean(e2, axis=0, keepdims=True)
  feats = jnp.concatenate([h1, h2, h1 * h2, h1 - h2], axis=-1)   # [1, 4D]
  logits = jnp.dot(feats.astype(jnp.bfloat16), w_ref[...],
                   preferred_element_type=jnp.float32) + b_ref[...]
  o_ref[0] = logits.astype(o_ref.dtype)


def dual_classifier(emb_1, emb_2, p):
  B, L, D = emb_1.shape
  C = p["cls_w"].shape[-1]
  out = pl.pallas_call(
      _dual_classifier_kernel,
      grid=(B,),
      in_specs=[
          pl.BlockSpec((1, L, D), lambda b: (b, 0, 0)),
          pl.BlockSpec((1, L, D), lambda b: (b, 0, 0)),
          _weight_spec((4 * D, C)),
          _weight_spec((1, C)),
      ],
      out_specs=pl.BlockSpec((1, 1, C), lambda b: (b, 0, 0)),
      out_shape=jax.ShapeDtypeStruct((B, 1, C), jnp.float32),
      compiler_params=pltpu.CompilerParams(
          dimension_semantics=("parallel",),
          vmem_limit_bytes=_VMEM_LIMIT),
  )(emb_1, emb_2, p["cls_w"], p["cls_b"])
  return out[:, 0, :]


# ----------------------------------------------------------------------------
# Glue (embedding gather + positional add) in plain JAX
# ----------------------------------------------------------------------------

def t_embedding(tokens, params):
  # TODO(synk): TEmbedding source unavailable; modeled as token embedding +
  # learned positional embedding (gather is glue, done in plain JAX).
  x = jnp.take(params["tok_emb"], tokens, axis=0)     # [B, L, D]
  return x + params["pos_emb"]                        # broadcast [1, L, D]


def _choose_l_tile(L):
  # Row-tile for the unpack+FFN kernel: multiple of 16 (bf16 sublane packing)
  # that divides L; prefer < L so the L grid axis actually pipelines.
  for cand in (512, 256, 128, 64, 32, 16):
    if cand < L and L % cand == 0:
      return cand
  return L


def luna_matcher_forward(params, tokens_1, tokens_2, num_heads):
  B = tokens_1.shape[0]
  additional_losses = []
  artifacts_1, artifacts_2 = [], []

  emb_1 = t_embedding(tokens_1, params["embed"])
  emb_2 = t_embedding(tokens_2, params["embed"])

  # Both streams share the encoder parameters and initial memory, so run them
  # as one batch of 2B (even -> balances v7x's two TensorCores). Inter-block
  # activations stay in bf16; f32 math happens inside the kernels.
  x = jnp.concatenate([emb_1, emb_2], axis=0).astype(jnp.bfloat16)
  mem = jnp.broadcast_to(
      params["mem"], (2 * B,) + params["mem"].shape[1:]).astype(jnp.bfloat16)

  l_tile = _choose_l_tile(x.shape[1])
  for blk in params["blocks"]:
    x, mem = luna_block(x, mem, blk, num_heads, l_tile)

  emb_1, emb_2 = x[:B], x[B:]
  logits = dual_classifier(emb_1, emb_2, params["classifier"])
  artifacts = list(zip(artifacts_1, artifacts_2))
  return logits, additional_losses, artifacts


# ----------------------------------------------------------------------------
# Deterministic parameter init
# ----------------------------------------------------------------------------

def init_params(key, *, classes, num_embeddings, seq_len, hidden_dim, qkv_dim,
                mlp_dim, num_heads, num_blocks, mem_size):
  ks = iter(jax.random.split(key, 8 + 8 * num_blocks))

  def w(shape, std=0.02, dtype=jnp.bfloat16):
    # MXU operands in bf16 (f32 accumulation inside the kernels).
    return (jax.random.normal(next(ks), shape, jnp.float32) * std).astype(dtype)

  def zeros(n):
    return jnp.zeros((1, n), jnp.float32)

  def ones(n):
    return jnp.ones((1, n), jnp.float32)

  params = {
      "embed": {
          "tok_emb": w((num_embeddings, hidden_dim), 0.02, jnp.float32),
          "pos_emb": w((1, seq_len, hidden_dim), 0.02, jnp.float32),
      },
      "mem": jax.random.normal(next(ks), (1, mem_size, hidden_dim), jnp.float32),
      "blocks": [],
      "classifier": {
          "cls_w": w((4 * hidden_dim, classes)),       # fused [4D, C] head
          "cls_b": zeros(classes),
      },
  }
  for _ in range(num_blocks):
    blk = {
        # shared_att='full': one attention param set shared by pack & unpack.
        "wq": w((hidden_dim, qkv_dim)), "bq": zeros(qkv_dim),
        # K and V projections fused into one matmul.
        "wkv": w((hidden_dim, 2 * qkv_dim)), "bkv": zeros(2 * qkv_dim),
        # Output projection as a single [qkv, D] matrix (heads concatenated).
        "wo": w((qkv_dim, hidden_dim)), "bo": zeros(hidden_dim),
        "ln_mem_g": ones(hidden_dim), "ln_mem_b": zeros(hidden_dim),
        "ln_att_g": ones(hidden_dim), "ln_att_b": zeros(hidden_dim),
        "ln_ffn_g": ones(hidden_dim), "ln_ffn_b": zeros(hidden_dim),
        "ffn_w1": w((hidden_dim, mlp_dim)), "ffn_b1": zeros(mlp_dim),
        "ffn_w2": w((mlp_dim, hidden_dim)), "ffn_b2": zeros(hidden_dim),
    }
    params["blocks"].append(blk)
  return params


# ----------------------------------------------------------------------------
# Main
# ----------------------------------------------------------------------------

if __name__ == "__main__":
  classes = 2
  num_embeddings = 32   # vocab size
  seq_len = 32          # divisible by the 16-row bf16 tile -> 2 L-tiles
  hidden_dim = 32
  qkv_dim = 32
  mlp_dim = 64
  num_heads = 4
  num_blocks = 2
  mem_size = 8
  batch = 2

  key = jax.random.PRNGKey(0)
  kp, k1, k2 = jax.random.split(key, 3)

  params = init_params(
      kp, classes=classes, num_embeddings=num_embeddings, seq_len=seq_len,
      hidden_dim=hidden_dim, qkv_dim=qkv_dim, mlp_dim=mlp_dim,
      num_heads=num_heads, num_blocks=num_blocks, mem_size=mem_size)

  tokens_1 = jax.random.randint(k1, (batch, seq_len), 0, num_embeddings, jnp.int32)
  tokens_2 = jax.random.randint(k2, (batch, seq_len), 0, num_embeddings, jnp.int32)

  fwd = jax.jit(functools.partial(luna_matcher_forward, num_heads=num_heads))
  logits, losses, artifacts = fwd(params, tokens_1, tokens_2)
  logits = jax.block_until_ready(logits)

  assert logits.shape == (batch, classes), logits.shape
  assert bool(jnp.all(jnp.isfinite(logits)))
  print("KERNEL_OK")
</pallas_src>

<mosaic_0001>
module attributes {stable_mosaic.version = 11 : i64} {
  func.func @_pack_kernel(%arg0: i32, %arg1: memref<1x32x32xbf16, #tpu.memory_space<vmem>>, %arg2: memref<1x8x32xbf16, #tpu.memory_space<vmem>>, %arg3: memref<32x32xbf16, #tpu.memory_space<vmem>>, %arg4: memref<1x32xf32, #tpu.memory_space<vmem>>, %arg5: memref<32x64xbf16, #tpu.memory_space<vmem>>, %arg6: memref<1x64xf32, #tpu.memory_space<vmem>>, %arg7: memref<32x32xbf16, #tpu.memory_space<vmem>>, %arg8: memref<1x32xf32, #tpu.memory_space<vmem>>, %arg9: memref<1x32xf32, #tpu.memory_space<vmem>>, %arg10: memref<1x32xf32, #tpu.memory_space<vmem>>, %arg11: memref<1x8x32xbf16, #tpu.memory_space<vmem>>) attributes {dimension_semantics = [#tpu.dimension_semantics<parallel>], iteration_bounds = array<i64: 4>, scalar_prefetch = 0 : i64, scratch_operands = 0 : i64, tpu.core_type = #tpu.core_type<tc>, window_params = [{transform_indices = @transform_0, window_bounds = array<i64: 1, 32, 32>}, {transform_indices = @transform_1, window_bounds = array<i64: 1, 8, 32>}, {pipeline_mode = #tpu.pipeline_mode<synchronous>, transform_indices = @transform_2, window_bounds = array<i64: 32, 32>}, {pipeline_mode = #tpu.pipeline_mode<synchronous>, transform_indices = @transform_3, window_bounds = array<i64: 1, 32>}, {pipeline_mode = #tpu.pipeline_mode<synchronous>, transform_indices = @transform_4, window_bounds = array<i64: 32, 64>}, {pipeline_mode = #tpu.pipeline_mode<synchronous>, transform_indices = @transform_5, window_bounds = array<i64: 1, 64>}, {pipeline_mode = #tpu.pipeline_mode<synchronous>, transform_indices = @transform_6, window_bounds = array<i64: 32, 32>}, {pipeline_mode = #tpu.pipeline_mode<synchronous>, transform_indices = @transform_7, window_bounds = array<i64: 1, 32>}, {pipeline_mode = #tpu.pipeline_mode<synchronous>, transform_indices = @transform_8, window_bounds = array<i64: 1, 32>}, {pipeline_mode = #tpu.pipeline_mode<synchronous>, transform_indices = @transform_9, window_bounds = array<i64: 1, 32>}, {transform_indices = @transform_10, window_bounds = array<i64: 1, 8, 32>}]} {
    %c0 = arith.constant 0 : index
    %c0_0 = arith.constant 0 : index
    %c0_1 = arith.constant 0 : index
    %0 = vector.load %arg1[%c0, %c0_0, %c0_1] : memref<1x32x32xbf16, #tpu.memory_space<vmem>>, vector<1x32x32xbf16>
    %1 = vector.shape_cast %0 : vector<1x32x32xbf16> to vector<32x32xbf16>
    %c0_2 = arith.constant 0 : index
    %c0_3 = arith.constant 0 : index
    %c0_4 = arith.constant 0 : index
    %2 = vector.load %arg2[%c0_2, %c0_3, %c0_4] : memref<1x8x32xbf16, #tpu.memory_space<vmem>>, vector<1x8x32xbf16>
    %3 = vector.shape_cast %2 : vector<1x8x32xbf16> to vector<8x32xbf16>
    %c0_5 = arith.constant 0 : index
    %c0_6 = arith.constant 0 : index
    %4 = vector.load %arg3[%c0_5, %c0_6] : memref<32x32xbf16, #tpu.memory_space<vmem>>, vector<32x32xbf16>
    %cst = arith.constant dense<0.000000e+00> : vector<8x32xf32>
    %5 = tpu.matmul %3, %4, %cst {dimension_numbers = #tpu.dot_dimension_numbers<[1], [0], [0], [1], [0, 0, 1, 1], [], []>} : vector<8x32xbf16>, vector<32x32xbf16>, vector<8x32xf32> -> vector<8x32xf32>
    %c0_7 = arith.constant 0 : index
    %c0_8 = arith.constant 0 : index
    %6 = vector.load %arg4[%c0_7, %c0_8] : memref<1x32xf32, #tpu.memory_space<vmem>>, vector<1x32xf32>
    %7 = vector.broadcast %6 : vector<1x32xf32> to vector<8x32xf32>
    %8 = arith.addf %5, %7 : vector<8x32xf32>
    %c0_9 = arith.constant 0 : index
    %c0_10 = arith.constant 0 : index
    %9 = vector.load %arg5[%c0_9, %c0_10] : memref<32x64xbf16, #tpu.memory_space<vmem>>, vector<32x64xbf16>
    %cst_11 = arith.constant dense<0.000000e+00> : vector<32x64xf32>
    %10 = tpu.matmul %1, %9, %cst_11 {dimension_numbers = #tpu.dot_dimension_numbers<[1], [0], [0], [1], [0, 0, 1, 1], [], []>} : vector<32x32xbf16>, vector<32x64xbf16>, vector<32x64xf32> -> vector<32x64xf32>
    %c0_12 = arith.constant 0 : index
    %c0_13 = arith.constant 0 : index
    %11 = vector.load %arg6[%c0_12, %c0_13] : memref<1x64xf32, #tpu.memory_space<vmem>>, vector<1x64xf32>
    %12 = vector.broadcast %11 : vector<1x64xf32> to vector<32x64xf32>
    %13 = arith.addf %10, %12 : vector<32x64xf32>
    %14 = arith.truncf %8 : vector<8x32xf32> to vector<8x32xbf16>
    %15 = vector.extract_strided_slice %13 {offsets = [0, 0], sizes = [32, 32], strides = [1, 1]} : vector<32x64xf32> to vector<32x32xf32>
    %16 = arith.truncf %15 : vector<32x32xf32> to vector<32x32xbf16>
    %17 = vector.extract_strided_slice %13 {offsets = [0, 32], sizes = [32, 32], strides = [1, 1]} : vector<32x64xf32> to vector<32x32xf32>
    %18 = arith.truncf %17 : vector<32x32xf32> to vector<32x32xbf16>
    %19 = vector.extract_strided_slice %14 {offsets = [0, 0], sizes = [8, 8], strides = [1, 1]} : vector<8x32xbf16> to vector<8x8xbf16>
    %20 = vector.extract_strided_slice %16 {offsets = [0, 0], sizes = [32, 8], strides = [1, 1]} : vector<32x32xbf16> to vector<32x8xbf16>
    %21 = vector.extract_strided_slice %18 {offsets = [0, 0], sizes = [32, 8], strides = [1, 1]} : vector<32x32xbf16> to vector<32x8xbf16>
    %cst_14 = arith.constant dense<0.000000e+00> : vector<8x32xf32>
    %22 = tpu.matmul %19, %20, %cst_14 {dimension_numbers = #tpu.dot_dimension_numbers<[1], [1], [0], [0], [0, 0, 1, 0], [], []>} : vector<8x8xbf16>, vector<32x8xbf16>, vector<8x32xf32> -> vector<8x32xf32>
    %cst_15 = arith.constant 0.353553385 : f32
    %23 = vector.broadcast %cst_15 : f32 to vector<8x32xf32>
    %24 = arith.mulf %22, %23 : vector<8x32xf32>
    %cst_16 = arith.constant dense<0xFF800000> : vector<8xf32>
    %25 = vector.multi_reduction <maximumf>, %24, %cst_16 [1] : vector<8x32xf32> to vector<8xf32>
    %26 = vector.shape_cast %25 : vector<8xf32> to vector<8x1xf32>
    %27 = vector.broadcast %26 : vector<8x1xf32> to vector<8x32xf32>
    %28 = arith.subf %24, %27 : vector<8x32xf32>
    %29 = math.exp %28 : vector<8x32xf32>
    %cst_17 = arith.constant dense<0.000000e+00> : vector<8xf32>
    %30 = vector.multi_reduction <add>, %29, %cst_17 [1] : vector<8x32xf32> to vector<8xf32>
    %31 = vector.shape_cast %30 : vector<8xf32> to vector<8x1xf32>
    %32 = tpu.reciprocal %31 {approx = true} : vector<8x1xf32> -> vector<8x1xf32>
    %33 = vector.broadcast %32 : vector<8x1xf32> to vector<8x32xf32>
    %34 = arith.mulf %29, %33 : vector<8x32xf32>
    %35 = arith.truncf %34 : vector<8x32xf32> to vector<8x32xbf16>
    %cst_18 = arith.constant dense<0.000000e+00> : vector<8x8xf32>
    %36 = tpu.matmul %35, %21, %cst_18 {dimension_numbers = #tpu.dot_dimension_numbers<[1], [0], [0], [1], [0, 0, 1, 1], [], []>} : vector<8x32xbf16>, vector<32x8xbf16>, vector<8x8xf32> -> vector<8x8xf32>
    %37 = vector.extract_strided_slice %14 {offsets = [0, 8], sizes = [8, 8], strides = [1, 1]} : vector<8x32xbf16> to vector<8x8xbf16>
    %38 = vector.extract_strided_slice %16 {offsets = [0, 8], sizes = [32, 8], strides = [1, 1]} : vector<32x32xbf16> to vector<32x8xbf16>
    %39 = vector.extract_strided_slice %18 {offsets = [0, 8], sizes = [32, 8], strides = [1, 1]} : vector<32x32xbf16> to vector<32x8xbf16>
    %cst_19 = arith.constant dense<0.000000e+00> : vector<8x32xf32>
    %40 = tpu.matmul %37, %38, %cst_19 {dimension_numbers = #tpu.dot_dimension_numbers<[1], [1], [0], [0], [0, 0, 1, 0], [], []>} : vector<8x8xbf16>, vector<32x8xbf16>, vector<8x32xf32> -> vector<8x32xf32>
    %cst_20 = arith.constant 0.353553385 : f32
    %41 = vector.broadcast %cst_20 : f32 to vector<8x32xf32>
    %42 = arith.mulf %40, %41 : vector<8x32xf32>
    %cst_21 = arith.constant dense<0xFF800000> : vector<8xf32>
    %43 = vector.multi_reduction <maximumf>, %42, %cst_21 [1] : vector<8x32xf32> to vector<8xf32>
    %44 = vector.shape_cast %43 : vector<8xf32> to vector<8x1xf32>
    %45 = vector.broadcast %44 : vector<8x1xf32> to vector<8x32xf32>
    %46 = arith.subf %42, %45 : vector<8x32xf32>
    %47 = math.exp %46 : vector<8x32xf32>
    %cst_22 = arith.constant dense<0.000000e+00> : vector<8xf32>
    %48 = vector.multi_reduction <add>, %47, %cst_22 [1] : vector<8x32xf32> to vector<8xf32>
    %49 = vector.shape_cast %48 : vector<8xf32> to vector<8x1xf32>
    %50 = tpu.reciprocal %49 {approx = true} : vector<8x1xf32> -> vector<8x1xf32>
    %51 = vector.broadcast %50 : vector<8x1xf32> to vector<8x32xf32>
    %52 = arith.mulf %47, %51 : vector<8x32xf32>
    %53 = arith.truncf %52 : vector<8x32xf32> to vector<8x32xbf16>
    %cst_23 = arith.constant dense<0.000000e+00> : vector<8x8xf32>
    %54 = tpu.matmul %53, %39, %cst_23 {dimension_numbers = #tpu.dot_dimension_numbers<[1], [0], [0], [1], [0, 0, 1, 1], [], []>} : vector<8x32xbf16>, vector<32x8xbf16>, vector<8x8xf32> -> vector<8x8xf32>
    %55 = vector.extract_strided_slice %14 {offsets = [0, 16], sizes = [8, 8], strides = [1, 1]} : vector<8x32xbf16> to vector<8x8xbf16>
    %56 = vector.extract_strided_slice %16 {offsets = [0, 16], sizes = [32, 8], strides = [1, 1]} : vector<32x32xbf16> to vector<32x8xbf16>
    %57 = vector.extract_strided_slice %18 {offsets = [0, 16], sizes = [32, 8], strides = [1, 1]} : vector<32x32xbf16> to vector<32x8xbf16>
    %cst_24 = arith.constant dense<0.000000e+00> : vector<8x32xf32>
    %58 = tpu.matmul %55, %56, %cst_24 {dimension_numbers = #tpu.dot_dimension_numbers<[1], [1], [0], [0], [0, 0, 1, 0], [], []>} : vector<8x8xbf16>, vector<32x8xbf16>, vector<8x32xf32> -> vector<8x32xf32>
    %cst_25 = arith.constant 0.353553385 : f32
    %59 = vector.broadcast %cst_25 : f32 to vector<8x32xf32>
    %60 = arith.mulf %58, %59 : vector<8x32xf32>
    %cst_26 = arith.constant dense<0xFF800000> : vector<8xf32>
    %61 = vector.multi_reduction <maximumf>, %60, %cst_26 [1] : vector<8x32xf32> to vector<8xf32>
    %62 = vector.shape_cast %61 : vector<8xf32> to vector<8x1xf32>
    %63 = vector.broadcast %62 : vector<8x1xf32> to vector<8x32xf32>
    %64 = arith.subf %60, %63 : vector<8x32xf32>
    %65 = math.exp %64 : vector<8x32xf32>
    %cst_27 = arith.constant dense<0.000000e+00> : vector<8xf32>
    %66 = vector.multi_reduction <add>, %65, %cst_27 [1] : vector<8x32xf32> to vector<8xf32>
    %67 = vector.shape_cast %66 : vector<8xf32> to vector<8x1xf32>
    %68 = tpu.reciprocal %67 {approx = true} : vector<8x1xf32> -> vector<8x1xf32>
    %69 = vector.broadcast %68 : vector<8x1xf32> to vector<8x32xf32>
    %70 = arith.mulf %65, %69 : vector<8x32xf32>
    %71 = arith.truncf %70 : vector<8x32xf32> to vector<8x32xbf16>
    %cst_28 = arith.constant dense<0.000000e+00> : vector<8x8xf32>
    %72 = tpu.matmul %71, %57, %cst_28 {dimension_numbers = #tpu.dot_dimension_numbers<[1], [0], [0], [1], [0, 0, 1, 1], [], []>} : vector<8x32xbf16>, vector<32x8xbf16>, vector<8x8xf32> -> vector<8x8xf32>
    %73 = vector.extract_strided_slice %14 {offsets = [0, 24], sizes = [8, 8], strides = [1, 1]} : vector<8x32xbf16> to vector<8x8xbf16>
    %74 = vector.extract_strided_slice %16 {offsets = [0, 24], sizes = [32, 8], strides = [1, 1]} : vector<32x32xbf16> to vector<32x8xbf16>
    %75 = vector.extract_strided_slice %18 {offsets = [0, 24], sizes = [32, 8], strides = [1, 1]} : vector<32x32xbf16> to vector<32x8xbf16>
    %cst_29 = arith.constant dense<0.000000e+00> : vector<8x32xf32>
    %76 = tpu.matmul %73, %74, %cst_29 {dimension_numbers = #tpu.dot_dimension_numbers<[1], [1], [0], [0], [0, 0, 1, 0], [], []>} : vector<8x8xbf16>, vector<32x8xbf16>, vector<8x32xf32> -> vector<8x32xf32>
    %cst_30 = arith.constant 0.353553385 : f32
    %77 = vector.broadcast %cst_30 : f32 to vector<8x32xf32>
    %78 = arith.mulf %76, %77 : vector<8x32xf32>
    %cst_31 = arith.constant dense<0xFF800000> : vector<8xf32>
    %79 = vector.multi_reduction <maximumf>, %78, %cst_31 [1] : vector<8x32xf32> to vector<8xf32>
    %80 = vector.shape_cast %79 : vector<8xf32> to vector<8x1xf32>
    %81 = vector.broadcast %80 : vector<8x1xf32> to vector<8x32xf32>
    %82 = arith.subf %78, %81 : vector<8x32xf32>
    %83 = math.exp %82 : vector<8x32xf32>
    %cst_32 = arith.constant dense<0.000000e+00> : vector<8xf32>
    %84 = vector.multi_reduction <add>, %83, %cst_32 [1] : vector<8x32xf32> to vector<8xf32>
    %85 = vector.shape_cast %84 : vector<8xf32> to vector<8x1xf32>
    %86 = tpu.reciprocal %85 {approx = true} : vector<8x1xf32> -> vector<8x1xf32>
    %87 = vector.broadcast %86 : vector<8x1xf32> to vector<8x32xf32>
    %88 = arith.mulf %83, %87 : vector<8x32xf32>
    %89 = arith.truncf %88 : vector<8x32xf32> to vector<8x32xbf16>
    %cst_33 = arith.constant dense<0.000000e+00> : vector<8x8xf32>
    %90 = tpu.matmul %89, %75, %cst_33 {dimension_numbers = #tpu.dot_dimension_numbers<[1], [0], [0], [1], [0, 0, 1, 1], [], []>} : vector<8x32xbf16>, vector<32x8xbf16>, vector<8x8xf32> -> vector<8x8xf32>
    %91 = tpu.concatenate %36, %54, %72, %90 in 1 : vector<8x8xf32>, vector<8x8xf32>, vector<8x8xf32>, vector<8x8xf32> -> vector<8x32xf32>
    %92 = arith.truncf %91 : vector<8x32xf32> to vector<8x32xbf16>
    %c0_34 = arith.constant 0 : index
    %c0_35 = arith.constant 0 : index
    %93 = vector.load %arg7[%c0_34, %c0_35] : memref<32x32xbf16, #tpu.memory_space<vmem>>, vector<32x32xbf16>
    %cst_36 = arith.constant dense<0.000000e+00> : vector<8x32xf32>
    %94 = tpu.matmul %92, %93, %cst_36 {dimension_numbers = #tpu.dot_dimension_numbers<[1], [0], [0], [1], [0, 0, 1, 1], [], []>} : vector<8x32xbf16>, vector<32x32xbf16>, vector<8x32xf32> -> vector<8x32xf32>
    %c0_37 = arith.constant 0 : index
    %c0_38 = arith.constant 0 : index
    %95 = vector.load %arg8[%c0_37, %c0_38] : memref<1x32xf32, #tpu.memory_space<vmem>>, vector<1x32xf32>
    %96 = vector.broadcast %95 : vector<1x32xf32> to vector<8x32xf32>
    %97 = arith.addf %94, %96 : vector<8x32xf32>
    %98 = arith.extf %3 : vector<8x32xbf16> to vector<8x32xf32>
    %99 = arith.addf %98, %97 : vector<8x32xf32>
    %cst_39 = arith.constant dense<0.000000e+00> : vector<8xf32>
    %100 = vector.multi_reduction <add>, %99, %cst_39 [1] : vector<8x32xf32> to vector<8xf32>
    %101 = vector.shape_cast %100 : vector<8xf32> to vector<8x1xf32>
    %cst_40 = arith.constant 3.200000e+01 : f32
    %102 = vector.broadcast %cst_40 : f32 to vector<8x1xf32>
    %103 = arith.divf %101, %102 : vector<8x1xf32>
    %104 = vector.broadcast %103 : vector<8x1xf32> to vector<8x32xf32>
    %105 = arith.subf %99, %104 : vector<8x32xf32>
    %106 = arith.mulf %105, %105 : vector<8x32xf32>
    %cst_41 = arith.constant dense<0.000000e+00> : vector<8xf32>
    %107 = vector.multi_reduction <add>, %106, %cst_41 [1] : vector<8x32xf32> to vector<8xf32>
    %108 = vector.shape_cast %107 : vector<8xf32> to vector<8x1xf32>
    %cst_42 = arith.constant 3.200000e+01 : f32
    %109 = vector.broadcast %cst_42 : f32 to vector<8x1xf32>
    %110 = arith.divf %108, %109 : vector<8x1xf32>
    %111 = vector.broadcast %103 : vector<8x1xf32> to vector<8x32xf32>
    %112 = arith.subf %99, %111 : vector<8x32xf32>
    %cst_43 = arith.constant 9.99999974E-6 : f32
    %113 = vector.broadcast %cst_43 : f32 to vector<8x1xf32>
    %114 = arith.addf %110, %113 : vector<8x1xf32>
    %115 = math.rsqrt %114 : vector<8x1xf32>
    %116 = vector.broadcast %115 : vector<8x1xf32> to vector<8x32xf32>
    %117 = arith.mulf %112, %116 : vector<8x32xf32>
    %c0_44 = arith.constant 0 : index
    %c0_45 = arith.constant 0 : index
    %118 = vector.load %arg9[%c0_44, %c0_45] : memref<1x32xf32, #tpu.memory_space<vmem>>, vector<1x32xf32>
    %119 = vector.broadcast %118 : vector<1x32xf32> to vector<8x32xf32>
    %120 = arith.mulf %117, %119 : vector<8x32xf32>
    %c0_46 = arith.constant 0 : index
    %c0_47 = arith.constant 0 : index
    %121 = vector.load %arg10[%c0_46, %c0_47] : memref<1x32xf32, #tpu.memory_space<vmem>>, vector<1x32xf32>
    %122 = vector.broadcast %121 : vector<1x32xf32> to vector<8x32xf32>
    %123 = arith.addf %120, %122 : vector<8x32xf32>
    %124 = arith.truncf %123 : vector<8x32xf32> to vector<8x32xbf16>
    %c0_48 = arith.constant 0 : index
    %c0_49 = arith.constant 0 : index
    %c0_50 = arith.constant 0 : index
    %125 = vector.load %arg11[%c0_48, %c0_49, %c0_50] : memref<1x8x32xbf16, #tpu.memory_space<vmem>>, vector<1x8x32xbf16>
    %126 = vector.shape_cast %125 : vector<1x8x32xbf16> to vector<8x32xbf16>
    %127 = vector.shape_cast %124 : vector<8x32xbf16> to vector<1x8x32xbf16>
    tpu.vector_store %arg11[%c0_48, %c0_49, %c0_50], %127 {strides = array<i32>} : memref<1x8x32xbf16, #tpu.memory_space<vmem>>, vector<1x8x32xbf16>,
    return
  }
  func.func @transform_0(%arg0: i32) -> (i32, i32, i32) {
    %c0_i32 = arith.constant 0 : i32
    %c0_i32_0 = arith.constant 0 : i32
    %c0_i32_1 = arith.constant 0 : i32
    return %arg0, %c0_i32, %c0_i32_0 : i32, i32, i32
  }
  func.func @transform_1(%arg0: i32) -> (i32, i32, i32) {
    %c0_i32 = arith.constant 0 : i32
    %c0_i32_0 = arith.constant 0 : i32
    %c0_i32_1 = arith.constant 0 : i32
    return %arg0, %c0_i32, %c0_i32_0 : i32, i32, i32
  }
  func.func @transform_2(%arg0: i32) -> (i32, i32) {
    %c0_i32 = arith.constant 0 : i32
    %c0_i32_0 = arith.constant 0 : i32
    %c0_i32_1 = arith.constant 0 : i32
    return %c0_i32, %c0_i32_0 : i32, i32
  }
  func.func @transform_3(%arg0: i32) -> (i32, i32) {
    %c0_i32 = arith.constant 0 : i32
    %c0_i32_0 = arith.constant 0 : i32
    %c0_i32_1 = arith.constant 0 : i32
    return %c0_i32, %c0_i32_0 : i32, i32
  }
  func.func @transform_4(%arg0: i32) -> (i32, i32) {
    %c0_i32 = arith.constant 0 : i32
    %c0_i32_0 = arith.constant 0 : i32
    %c0_i32_1 = arith.constant 0 : i32
    return %c0_i32, %c0_i32_0 : i32, i32
  }
  func.func @transform_5(%arg0: i32) -> (i32, i32) {
    %c0_i32 = arith.constant 0 : i32
    %c0_i32_0 = arith.constant 0 : i32
    %c0_i32_1 = arith.constant 0 : i32
    return %c0_i32, %c0_i32_0 : i32, i32
  }
  func.func @transform_6(%arg0: i32) -> (i32, i32) {
    %c0_i32 = arith.constant 0 : i32
    %c0_i32_0 = arith.constant 0 : i32
    %c0_i32_1 = arith.constant 0 : i32
    return %c0_i32, %c0_i32_0 : i32, i32
  }
  func.func @transform_7(%arg0: i32) -> (i32, i32) {
    %c0_i32 = arith.constant 0 : i32
    %c0_i32_0 = arith.constant 0 : i32
    %c0_i32_1 = arith.constant 0 : i32
    return %c0_i32, %c0_i32_0 : i32, i32
  }
  func.func @transform_8(%arg0: i32) -> (i32, i32) {
    %c0_i32 = arith.constant 0 : i32
    %c0_i32_0 = arith.constant 0 : i32
    %c0_i32_1 = arith.constant 0 : i32
    return %c0_i32, %c0_i32_0 : i32, i32
  }
  func.func @transform_9(%arg0: i32) -> (i32, i32) {
    %c0_i32 = arith.constant 0 : i32
    %c0_i32_0 = arith.constant 0 : i32
    %c0_i32_1 = arith.constant 0 : i32
    return %c0_i32, %c0_i32_0 : i32, i32
  }
  func.func @transform_10(%arg0: i32) -> (i32, i32, i32) {
    %c0_i32 = arith.constant 0 : i32
    %c0_i32_0 = arith.constant 0 : i32
    %c0_i32_1 = arith.constant 0 : i32
    return %arg0, %c0_i32, %c0_i32_0 : i32, i32, i32
  }
}

module attributes {stable_mosaic.version = 11 : i64} {
  func.func @_dual_classifier_kernel(%arg0: i32, %arg1: memref<1x32x32xbf16, #tpu.memory_space<vmem>>, %arg2: memref<1x32x32xbf16, #tpu.memory_space<vmem>>, %arg3: memref<128x2xbf16, #tpu.memory_space<vmem>>, %arg4: memref<1x2xf32, #tpu.memory_space<vmem>>, %arg5: memref<1x1x2xf32, #tpu.memory_space<vmem>>) attributes {dimension_semantics = [#tpu.dimension_semantics<parallel>], iteration_bounds = array<i64: 2>, scalar_prefetch = 0 : i64, scratch_operands = 0 : i64, tpu.core_type = #tpu.core_type<tc>, window_params = [{transform_indices = @transform_0, window_bounds = array<i64: 1, 32, 32>}, {transform_indices = @transform_1, window_bounds = array<i64: 1, 32, 32>}, {pipeline_mode = #tpu.pipeline_mode<synchronous>, transform_indices = @transform_2, window_bounds = array<i64: 128, 2>}, {pipeline_mode = #tpu.pipeline_mode<synchronous>, transform_indices = @transform_3, window_bounds = array<i64: 1, 2>}, {transform_indices = @transform_4, window_bounds = array<i64: 1, 1, 2>}]} {
    %c0 = arith.constant 0 : index
    %c0_0 = arith.constant 0 : index
    %c0_1 = arith.constant 0 : index
    %0 = vector.load %arg1[%c0, %c0_0, %c0_1] : memref<1x32x32xbf16, #tpu.memory_space<vmem>>, vector<1x32x32xbf16>
    %1 = vector.shape_cast %0 : vector<1x32x32xbf16> to vector<32x32xbf16>
    %2 = arith.extf %1 : vector<32x32xbf16> to vector<32x32xf32>
    %c0_2 = arith.constant 0 : index
    %c0_3 = arith.constant 0 : index
    %c0_4 = arith.constant 0 : index
    %3 = vector.load %arg2[%c0_2, %c0_3, %c0_4] : memref<1x32x32xbf16, #tpu.memory_space<vmem>>, vector<1x32x32xbf16>
    %4 = vector.shape_cast %3 : vector<1x32x32xbf16> to vector<32x32xbf16>
    %5 = arith.extf %4 : vector<32x32xbf16> to vector<32x32xf32>
    %cst = arith.constant dense<0.000000e+00> : vector<32xf32>
    %6 = vector.multi_reduction <add>, %2, %cst [0] : vector<32x32xf32> to vector<32xf32>
    %7 = vector.shape_cast %6 : vector<32xf32> to vector<1x32xf32>
    %cst_5 = arith.constant 3.200000e+01 : f32
    %8 = vector.broadcast %cst_5 : f32 to vector<1x32xf32>
    %9 = arith.divf %7, %8 : vector<1x32xf32>
    %cst_6 = arith.constant dense<0.000000e+00> : vector<32xf32>
    %10 = vector.multi_reduction <add>, %5, %cst_6 [0] : vector<32x32xf32> to vector<32xf32>
    %11 = vector.shape_cast %10 : vector<32xf32> to vector<1x32xf32>
    %cst_7 = arith.constant 3.200000e+01 : f32
    %12 = vector.broadcast %cst_7 : f32 to vector<1x32xf32>
    %13 = arith.divf %11, %12 : vector<1x32xf32>
    %14 = arith.mulf %9, %13 : vector<1x32xf32>
    %15 = arith.subf %9, %13 : vector<1x32xf32>
    %16 = tpu.concatenate %9, %13, %14, %15 in 1 : vector<1x32xf32>, vector<1x32xf32>, vector<1x32xf32>, vector<1x32xf32> -> vector<1x128xf32>
    %17 = arith.truncf %16 : vector<1x128xf32> to vector<1x128xbf16>
    %c0_8 = arith.constant 0 : index
    %c0_9 = arith.constant 0 : index
    %18 = vector.load %arg3[%c0_8, %c0_9] : memref<128x2xbf16, #tpu.memory_space<vmem>>, vector<128x2xbf16>
    %cst_10 = arith.constant dense<0.000000e+00> : vector<1x2xf32>
    %19 = tpu.matmul %17, %18, %cst_10 {dimension_numbers = #tpu.dot_dimension_numbers<[1], [0], [0], [1], [0, 0, 1, 1], [], []>} : vector<1x128xbf16>, vector<128x2xbf16>, vector<1x2xf32> -> vector<1x2xf32>
    %c0_11 = arith.constant 0 : index
    %c0_12 = arith.constant 0 : index
    %20 = vector.load %arg4[%c0_11, %c0_12] : memref<1x2xf32, #tpu.memory_space<vmem>>, vector<1x2xf32>
    %21 = arith.addf %19, %20 : vector<1x2xf32>
    %c0_13 = arith.constant 0 : index
    %c0_14 = arith.constant 0 : index
    %c0_15 = arith.constant 0 : index
    %22 = vector.load %arg5[%c0_13, %c0_14, %c0_15] : memref<1x1x2xf32, #tpu.memory_space<vmem>>, vector<1x1x2xf32>
    %23 = vector.shape_cast %22 : vector<1x1x2xf32> to vector<1x2xf32>
    %24 = vector.shape_cast %21 : vector<1x2xf32> to vector<1x1x2xf32>
    tpu.vector_store %arg5[%c0_13, %c0_14, %c0_15], %24 {strides = array<i32>} : memref<1x1x2xf32, #tpu.memory_space<vmem>>, vector<1x1x2xf32>,
    return
  }
  func.func @transform_0(%arg0: i32) -> (i32, i32, i32) {
    %c0_i32 = arith.constant 0 : i32
    %c0_i32_0 = arith.constant 0 : i32
    %c0_i32_1 = arith.constant 0 : i32
    return %arg0, %c0_i32, %c0_i32_0 : i32, i32, i32
  }
  func.func @transform_1(%arg0: i32) -> (i32, i32, i32) {
    %c0_i32 = arith.constant 0 : i32
    %c0_i32_0 = arith.constant 0 : i32
    %c0_i32_1 = arith.constant 0 : i32
    return %arg0, %c0_i32, %c0_i32_0 : i32, i32, i32
  }
  func.func @transform_2(%arg0: i32) -> (i32, i32) {
    %c0_i32 = arith.constant 0 : i32
    %c0_i32_0 = arith.constant 0 : i32
    %c0_i32_1 = arith.constant 0 : i32
    return %c0_i32, %c0_i32_0 : i32, i32
  }
  func.func @transform_3(%arg0: i32) -> (i32, i32) {
    %c0_i32 = arith.constant 0 : i32
    %c0_i32_0 = arith.constant 0 : i32
    %c0_i32_1 = arith.constant 0 : i32
    return %c0_i32, %c0_i32_0 : i32, i32
  }
  func.func @transform_4(%arg0: i32) -> (i32, i32, i32) {
    %c0_i32 = arith.constant 0 : i32
    %c0_i32_0 = arith.constant 0 : i32
    %c0_i32_1 = arith.constant 0 : i32
    return %arg0, %c0_i32, %c0_i32_0 : i32, i32, i32
  }
}

module attributes {stable_mosaic.version = 11 : i64} {
  func.func @_unpack_ffn_kernel(%arg0: i32, %arg1: i32, %arg2: memref<1x16x32xbf16, #tpu.memory_space<vmem>>, %arg3: memref<1x8x32xbf16, #tpu.memory_space<vmem>>, %arg4: memref<32x32xbf16, #tpu.memory_space<vmem>>, %arg5: memref<1x32xf32, #tpu.memory_space<vmem>>, %arg6: memref<32x64xbf16, #tpu.memory_space<vmem>>, %arg7: memref<1x64xf32, #tpu.memory_space<vmem>>, %arg8: memref<32x32xbf16, #tpu.memory_space<vmem>>, %arg9: memref<1x32xf32, #tpu.memory_space<vmem>>, %arg10: memref<1x32xf32, #tpu.memory_space<vmem>>, %arg11: memref<1x32xf32, #tpu.memory_space<vmem>>, %arg12: memref<1x32xf32, #tpu.memory_space<vmem>>, %arg13: memref<1x32xf32, #tpu.memory_space<vmem>>, %arg14: memref<32x64xbf16, #tpu.memory_space<vmem>>, %arg15: memref<1x64xf32, #tpu.memory_space<vmem>>, %arg16: memref<64x32xbf16, #tpu.memory_space<vmem>>, %arg17: memref<1x32xf32, #tpu.memory_space<vmem>>, %arg18: memref<1x16x32xbf16, #tpu.memory_space<vmem>>) attributes {dimension_semantics = [#tpu.dimension_semantics<parallel>, #tpu.dimension_semantics<parallel>], iteration_bounds = array<i64: 4, 2>, scalar_prefetch = 0 : i64, scratch_operands = 0 : i64, tpu.core_type = #tpu.core_type<tc>, window_params = [{transform_indices = @transform_0, window_bounds = array<i64: 1, 16, 32>}, {transform_indices = @transform_1, window_bounds = array<i64: 1, 8, 32>}, {pipeline_mode = #tpu.pipeline_mode<synchronous>, transform_indices = @transform_2, window_bounds = array<i64: 32, 32>}, {pipeline_mode = #tpu.pipeline_mode<synchronous>, transform_indices = @transform_3, window_bounds = array<i64: 1, 32>}, {pipeline_mode = #tpu.pipeline_mode<synchronous>, transform_indices = @transform_4, window_bounds = array<i64: 32, 64>}, {pipeline_mode = #tpu.pipeline_mode<synchronous>, transform_indices = @transform_5, window_bounds = array<i64: 1, 64>}, {pipeline_mode = #tpu.pipeline_mode<synchronous>, transform_indices = @transform_6, window_bounds = array<i64: 32, 32>}, {pipeline_mode = #tpu.pipeline_mode<synchronous>, transform_indices = @transform_7, window_bounds = array<i64: 1, 32>}, {pipeline_mode = #tpu.pipeline_mode<synchronous>, transform_indices = @transform_8, window_bounds = array<i64: 1, 32>}, {pipeline_mode = #tpu.pipeline_mode<synchronous>, transform_indices = @transform_9, window_bounds = array<i64: 1, 32>}, {pipeline_mode = #tpu.pipeline_mode<synchronous>, transform_indices = @transform_10, window_bounds = array<i64: 1, 32>}, {pipeline_mode = #tpu.pipeline_mode<synchronous>, transform_indices = @transform_11, window_bounds = array<i64: 1, 32>}, {pipeline_mode = #tpu.pipeline_mode<synchronous>, transform_indices = @transform_12, window_bounds = array<i64: 32, 64>}, {pipeline_mode = #tpu.pipeline_mode<synchronous>, transform_indices = @transform_13, window_bounds = array<i64: 1, 64>}, {pipeline_mode = #tpu.pipeline_mode<synchronous>, transform_indices = @transform_14, window_bounds = array<i64: 64, 32>}, {pipeline_mode = #tpu.pipeline_mode<synchronous>, transform_indices = @transform_15, window_bounds = array<i64: 1, 32>}, {transform_indices = @transform_16, window_bounds = array<i64: 1, 16, 32>}]} {
    %c0 = arith.constant 0 : index
    %c0_0 = arith.constant 0 : index
    %c0_1 = arith.constant 0 : index
    %0 = vector.load %arg2[%c0, %c0_0, %c0_1] : memref<1x16x32xbf16, #tpu.memory_space<vmem>>, vector<1x16x32xbf16>
    %1 = vector.shape_cast %0 : vector<1x16x32xbf16> to vector<16x32xbf16>
    %c0_2 = arith.constant 0 : index
    %c0_3 = arith.constant 0 : index
    %c0_4 = arith.constant 0 : index
    %2 = vector.load %arg3[%c0_2, %c0_3, %c0_4] : memref<1x8x32xbf16, #tpu.memory_space<vmem>>, vector<1x8x32xbf16>
    %3 = vector.shape_cast %2 : vector<1x8x32xbf16> to vector<8x32xbf16>
    %c0_5 = arith.constant 0 : index
    %c0_6 = arith.constant 0 : index
    %4 = vector.load %arg4[%c0_5, %c0_6] : memref<32x32xbf16, #tpu.memory_space<vmem>>, vector<32x32xbf16>
    %cst = arith.constant dense<0.000000e+00> : vector<16x32xf32>
    %5 = tpu.matmul %1, %4, %cst {dimension_numbers = #tpu.dot_dimension_numbers<[1], [0], [0], [1], [0, 0, 1, 1], [], []>} : vector<16x32xbf16>, vector<32x32xbf16>, vector<16x32xf32> -> vector<16x32xf32>
    %c0_7 = arith.constant 0 : index
    %c0_8 = arith.constant 0 : index
    %6 = vector.load %arg5[%c0_7, %c0_8] : memref<1x32xf32, #tpu.memory_space<vmem>>, vector<1x32xf32>
    %7 = vector.broadcast %6 : vector<1x32xf32> to vector<16x32xf32>
    %8 = arith.addf %5, %7 : vector<16x32xf32>
    %c0_9 = arith.constant 0 : index
    %c0_10 = arith.constant 0 : index
    %9 = vector.load %arg6[%c0_9, %c0_10] : memref<32x64xbf16, #tpu.memory_space<vmem>>, vector<32x64xbf16>
    %cst_11 = arith.constant dense<0.000000e+00> : vector<8x64xf32>
    %10 = tpu.matmul %3, %9, %cst_11 {dimension_numbers = #tpu.dot_dimension_numbers<[1], [0], [0], [1], [0, 0, 1, 1], [], []>} : vector<8x32xbf16>, vector<32x64xbf16>, vector<8x64xf32> -> vector<8x64xf32>
    %c0_12 = arith.constant 0 : index
    %c0_13 = arith.constant 0 : index
    %11 = vector.load %arg7[%c0_12, %c0_13] : memref<1x64xf32, #tpu.memory_space<vmem>>, vector<1x64xf32>
    %12 = vector.broadcast %11 : vector<1x64xf32> to vector<8x64xf32>
    %13 = arith.addf %10, %12 : vector<8x64xf32>
    %14 = arith.truncf %8 : vector<16x32xf32> to vector<16x32xbf16>
    %15 = vector.extract_strided_slice %13 {offsets = [0, 0], sizes = [8, 32], strides = [1, 1]} : vector<8x64xf32> to vector<8x32xf32>
    %16 = arith.truncf %15 : vector<8x32xf32> to vector<8x32xbf16>
    %17 = vector.extract_strided_slice %13 {offsets = [0, 32], sizes = [8, 32], strides = [1, 1]} : vector<8x64xf32> to vector<8x32xf32>
    %18 = arith.truncf %17 : vector<8x32xf32> to vector<8x32xbf16>
    %19 = vector.extract_strided_slice %14 {offsets = [0, 0], sizes = [16, 8], strides = [1, 1]} : vector<16x32xbf16> to vector<16x8xbf16>
    %20 = vector.extract_strided_slice %16 {offsets = [0, 0], sizes = [8, 8], strides = [1, 1]} : vector<8x32xbf16> to vector<8x8xbf16>
    %21 = vector.extract_strided_slice %18 {offsets = [0, 0], sizes = [8, 8], strides = [1, 1]} : vector<8x32xbf16> to vector<8x8xbf16>
    %cst_14 = arith.constant dense<0.000000e+00> : vector<16x8xf32>
    %22 = tpu.matmul %19, %20, %cst_14 {dimension_numbers = #tpu.dot_dimension_numbers<[1], [1], [0], [0], [0, 0, 1, 0], [], []>} : vector<16x8xbf16>, vector<8x8xbf16>, vector<16x8xf32> -> vector<16x8xf32>
    %cst_15 = arith.constant 0.353553385 : f32
    %23 = vector.broadcast %cst_15 : f32 to vector<16x8xf32>
    %24 = arith.mulf %22, %23 : vector<16x8xf32>
    %cst_16 = arith.constant dense<0xFF800000> : vector<16xf32>
    %25 = vector.multi_reduction <maximumf>, %24, %cst_16 [1] : vector<16x8xf32> to vector<16xf32>
    %26 = vector.shape_cast %25 : vector<16xf32> to vector<16x1xf32>
    %27 = vector.broadcast %26 : vector<16x1xf32> to vector<16x8xf32>
    %28 = arith.subf %24, %27 : vector<16x8xf32>
    %29 = math.exp %28 : vector<16x8xf32>
    %cst_17 = arith.constant dense<0.000000e+00> : vector<16xf32>
    %30 = vector.multi_reduction <add>, %29, %cst_17 [1] : vector<16x8xf32> to vector<16xf32>
    %31 = vector.shape_cast %30 : vector<16xf32> to vector<16x1xf32>
    %32 = tpu.reciprocal %31 {approx = true} : vector<16x1xf32> -> vector<16x1xf32>
    %33 = vector.broadcast %32 : vector<16x1xf32> to vector<16x8xf32>
    %34 = arith.mulf %29, %33 : vector<16x8xf32>
    %35 = arith.truncf %34 : vector<16x8xf32> to vector<16x8xbf16>
    %cst_18 = arith.constant dense<0.000000e+00> : vector<16x8xf32>
    %36 = tpu.matmul %35, %21, %cst_18 {dimension_numbers = #tpu.dot_dimension_numbers<[1], [0], [0], [1], [0, 0, 1, 1], [], []>} : vector<16x8xbf16>, vector<8x8xbf16>, vector<16x8xf32> -> vector<16x8xf32>
    %37 = vector.extract_strided_slice %14 {offsets = [0, 8], sizes = [16, 8], strides = [1, 1]} : vector<16x32xbf16> to vector<16x8xbf16>
    %38 = vector.extract_strided_slice %16 {offsets = [0, 8], sizes = [8, 8], strides = [1, 1]} : vector<8x32xbf16> to vector<8x8xbf16>
    %39 = vector.extract_strided_slice %18 {offsets = [0, 8], sizes = [8, 8], strides = [1, 1]} : vector<8x32xbf16> to vector<8x8xbf16>
    %cst_19 = arith.constant dense<0.000000e+00> : vector<16x8xf32>
    %40 = tpu.matmul %37, %38, %cst_19 {dimension_numbers = #tpu.dot_dimension_numbers<[1], [1], [0], [0], [0, 0, 1, 0], [], []>} : vector<16x8xbf16>, vector<8x8xbf16>, vector<16x8xf32> -> vector<16x8xf32>
    %cst_20 = arith.constant 0.353553385 : f32
    %41 = vector.broadcast %cst_20 : f32 to vector<16x8xf32>
    %42 = arith.mulf %40, %41 : vector<16x8xf32>
    %cst_21 = arith.constant dense<0xFF800000> : vector<16xf32>
    %43 = vector.multi_reduction <maximumf>, %42, %cst_21 [1] : vector<16x8xf32> to vector<16xf32>
    %44 = vector.shape_cast %43 : vector<16xf32> to vector<16x1xf32>
    %45 = vector.broadcast %44 : vector<16x1xf32> to vector<16x8xf32>
    %46 = arith.subf %42, %45 : vector<16x8xf32>
    %47 = math.exp %46 : vector<16x8xf32>
    %cst_22 = arith.constant dense<0.000000e+00> : vector<16xf32>
    %48 = vector.multi_reduction <add>, %47, %cst_22 [1] : vector<16x8xf32> to vector<16xf32>
    %49 = vector.shape_cast %48 : vector<16xf32> to vector<16x1xf32>
    %50 = tpu.reciprocal %49 {approx = true} : vector<16x1xf32> -> vector<16x1xf32>
    %51 = vector.broadcast %50 : vector<16x1xf32> to vector<16x8xf32>
    %52 = arith.mulf %47, %51 : vector<16x8xf32>
    %53 = arith.truncf %52 : vector<16x8xf32> to vector<16x8xbf16>
    %cst_23 = arith.constant dense<0.000000e+00> : vector<16x8xf32>
    %54 = tpu.matmul %53, %39, %cst_23 {dimension_numbers = #tpu.dot_dimension_numbers<[1], [0], [0], [1], [0, 0, 1, 1], [], []>} : vector<16x8xbf16>, vector<8x8xbf16>, vector<16x8xf32> -> vector<16x8xf32>
    %55 = vector.extract_strided_slice %14 {offsets = [0, 16], sizes = [16, 8], strides = [1, 1]} : vector<16x32xbf16> to vector<16x8xbf16>
    %56 = vector.extract_strided_slice %16 {offsets = [0, 16], sizes = [8, 8], strides = [1, 1]} : vector<8x32xbf16> to vector<8x8xbf16>
    %57 = vector.extract_strided_slice %18 {offsets = [0, 16], sizes = [8, 8], strides = [1, 1]} : vector<8x32xbf16> to vector<8x8xbf16>
    %cst_24 = arith.constant dense<0.000000e+00> : vector<16x8xf32>
    %58 = tpu.matmul %55, %56, %cst_24 {dimension_numbers = #tpu.dot_dimension_numbers<[1], [1], [0], [0], [0, 0, 1, 0], [], []>} : vector<16x8xbf16>, vector<8x8xbf16>, vector<16x8xf32> -> vector<16x8xf32>
    %cst_25 = arith.constant 0.353553385 : f32
    %59 = vector.broadcast %cst_25 : f32 to vector<16x8xf32>
    %60 = arith.mulf %58, %59 : vector<16x8xf32>
    %cst_26 = arith.constant dense<0xFF800000> : vector<16xf32>
    %61 = vector.multi_reduction <maximumf>, %60, %cst_26 [1] : vector<16x8xf32> to vector<16xf32>
    %62 = vector.shape_cast %61 : vector<16xf32> to vector<16x1xf32>
    %63 = vector.broadcast %62 : vector<16x1xf32> to vector<16x8xf32>
    %64 = arith.subf %60, %63 : vector<16x8xf32>
    %65 = math.exp %64 : vector<16x8xf32>
    %cst_27 = arith.constant dense<0.000000e+00> : vector<16xf32>
    %66 = vector.multi_reduction <add>, %65, %cst_27 [1] : vector<16x8xf32> to vector<16xf32>
    %67 = vector.shape_cast %66 : vector<16xf32> to vector<16x1xf32>
    %68 = tpu.reciprocal %67 {approx = true} : vector<16x1xf32> -> vector<16x1xf32>
    %69 = vector.broadcast %68 : vector<16x1xf32> to vector<16x8xf32>
    %70 = arith.mulf %65, %69 : vector<16x8xf32>
    %71 = arith.truncf %70 : vector<16x8xf32> to vector<16x8xbf16>
    %cst_28 = arith.constant dense<0.000000e+00> : vector<16x8xf32>
    %72 = tpu.matmul %71, %57, %cst_28 {dimension_numbers = #tpu.dot_dimension_numbers<[1], [0], [0], [1], [0, 0, 1, 1], [], []>} : vector<16x8xbf16>, vector<8x8xbf16>, vector<16x8xf32> -> vector<16x8xf32>
    %73 = vector.extract_strided_slice %14 {offsets = [0, 24], sizes = [16, 8], strides = [1, 1]} : vector<16x32xbf16> to vector<16x8xbf16>
    %74 = vector.extract_strided_slice %16 {offsets = [0, 24], sizes = [8, 8], strides = [1, 1]} : vector<8x32xbf16> to vector<8x8xbf16>
    %75 = vector.extract_strided_slice %18 {offsets = [0, 24], sizes = [8, 8], strides = [1, 1]} : vector<8x32xbf16> to vector<8x8xbf16>
    %cst_29 = arith.constant dense<0.000000e+00> : vector<16x8xf32>
    %76 = tpu.matmul %73, %74, %cst_29 {dimension_numbers = #tpu.dot_dimension_numbers<[1], [1], [0], [0], [0, 0, 1, 0], [], []>} : vector<16x8xbf16>, vector<8x8xbf16>, vector<16x8xf32> -> vector<16x8xf32>
    %cst_30 = arith.constant 0.353553385 : f32
    %77 = vector.broadcast %cst_30 : f32 to vector<16x8xf32>
    %78 = arith.mulf %76, %77 : vector<16x8xf32>
    %cst_31 = arith.constant dense<0xFF800000> : vector<16xf32>
    %79 = vector.multi_reduction <maximumf>, %78, %cst_31 [1] : vector<16x8xf32> to vector<16xf32>
    %80 = vector.shape_cast %79 : vector<16xf32> to vector<16x1xf32>
    %81 = vector.broadcast %80 : vector<16x1xf32> to vector<16x8xf32>
    %82 = arith.subf %78, %81 : vector<16x8xf32>
    %83 = math.exp %82 : vector<16x8xf32>
    %cst_32 = arith.constant dense<0.000000e+00> : vector<16xf32>
    %84 = vector.multi_reduction <add>, %83, %cst_32 [1] : vector<16x8xf32> to vector<16xf32>
    %85 = vector.shape_cast %84 : vector<16xf32> to vector<16x1xf32>
    %86 = tpu.reciprocal %85 {approx = true} : vector<16x1xf32> -> vector<16x1xf32>
    %87 = vector.broadcast %86 : vector<16x1xf32> to vector<16x8xf32>
    %88 = arith.mulf %83, %87 : vector<16x8xf32>
    %89 = arith.truncf %88 : vector<16x8xf32> to vector<16x8xbf16>
    %cst_33 = arith.constant dense<0.000000e+00> : vector<16x8xf32>
    %90 = tpu.matmul %89, %75, %cst_33 {dimension_numbers = #tpu.dot_dimension_numbers<[1], [0], [0], [1], [0, 0, 1, 1], [], []>} : vector<16x8xbf16>, vector<8x8xbf16>, vector<16x8xf32> -> vector<16x8xf32>
    %91 = tpu.concatenate %36, %54, %72, %90 in 1 : vector<16x8xf32>, vector<16x8xf32>, vector<16x8xf32>, vector<16x8xf32> -> vector<16x32xf32>
    %92 = arith.truncf %91 : vector<16x32xf32> to vector<16x32xbf16>
    %c0_34 = arith.constant 0 : index
    %c0_35 = arith.constant 0 : index
    %93 = vector.load %arg8[%c0_34, %c0_35] : memref<32x32xbf16, #tpu.memory_space<vmem>>, vector<32x32xbf16>
    %cst_36 = arith.constant dense<0.000000e+00> : vector<16x32xf32>
    %94 = tpu.matmul %92, %93, %cst_36 {dimension_numbers = #tpu.dot_dimension_numbers<[1], [0], [0], [1], [0, 0, 1, 1], [], []>} : vector<16x32xbf16>, vector<32x32xbf16>, vector<16x32xf32> -> vector<16x32xf32>
    %c0_37 = arith.constant 0 : index
    %c0_38 = arith.constant 0 : index
    %95 = vector.load %arg9[%c0_37, %c0_38] : memref<1x32xf32, #tpu.memory_space<vmem>>, vector<1x32xf32>
    %96 = vector.broadcast %95 : vector<1x32xf32> to vector<16x32xf32>
    %97 = arith.addf %94, %96 : vector<16x32xf32>
    %98 = arith.extf %1 : vector<16x32xbf16> to vector<16x32xf32>
    %99 = arith.addf %98, %97 : vector<16x32xf32>
    %cst_39 = arith.constant dense<0.000000e+00> : vector<16xf32>
    %100 = vector.multi_reduction <add>, %99, %cst_39 [1] : vector<16x32xf32> to vector<16xf32>
    %101 = vector.shape_cast %100 : vector<16xf32> to vector<16x1xf32>
    %cst_40 = arith.constant 3.200000e+01 : f32
    %102 = vector.broadcast %cst_40 : f32 to vector<16x1xf32>
    %103 = arith.divf %101, %102 : vector<16x1xf32>
    %104 = vector.broadcast %103 : vector<16x1xf32> to vector<16x32xf32>
    %105 = arith.subf %99, %104 : vector<16x32xf32>
    %106 = arith.mulf %105, %105 : vector<16x32xf32>
    %cst_41 = arith.constant dense<0.000000e+00> : vector<16xf32>
    %107 = vector.multi_reduction <add>, %106, %cst_41 [1] : vector<16x32xf32> to vector<16xf32>
    %108 = vector.shape_cast %107 : vector<16xf32> to vector<16x1xf32>
    %cst_42 = arith.constant 3.200000e+01 : f32
    %109 = vector.broadcast %cst_42 : f32 to vector<16x1xf32>
    %110 = arith.divf %108, %109 : vector<16x1xf32>
    %111 = vector.broadcast %103 : vector<16x1xf32> to vector<16x32xf32>
    %112 = arith.subf %99, %111 : vector<16x32xf32>
    %cst_43 = arith.constant 9.99999974E-6 : f32
    %113 = vector.broadcast %cst_43 : f32 to vector<16x1xf32>
    %114 = arith.addf %110, %113 : vector<16x1xf32>
    %115 = math.rsqrt %114 : vector<16x1xf32>
    %116 = vector.broadcast %115 : vector<16x1xf32> to vector<16x32xf32>
    %117 = arith.mulf %112, %116 : vector<16x32xf32>
    %c0_44 = arith.constant 0 : index
    %c0_45 = arith.constant 0 : index
    %118 = vector.load %arg10[%c0_44, %c0_45] : memref<1x32xf32, #tpu.memory_space<vmem>>, vector<1x32xf32>
    %119 = vector.broadcast %118 : vector<1x32xf32> to vector<16x32xf32>
    %120 = arith.mulf %117, %119 : vector<16x32xf32>
    %c0_46 = arith.constant 0 : index
    %c0_47 = arith.constant 0 : index
    %121 = vector.load %arg11[%c0_46, %c0_47] : memref<1x32xf32, #tpu.memory_space<vmem>>, vector<1x32xf32>
    %122 = vector.broadcast %121 : vector<1x32xf32> to vector<16x32xf32>
    %123 = arith.addf %120, %122 : vector<16x32xf32>
    %124 = arith.truncf %123 : vector<16x32xf32> to vector<16x32xbf16>
    %c0_48 = arith.constant 0 : index
    %c0_49 = arith.constant 0 : index
    %125 = vector.load %arg14[%c0_48, %c0_49] : memref<32x64xbf16, #tpu.memory_space<vmem>>, vector<32x64xbf16>
    %cst_50 = arith.constant dense<0.000000e+00> : vector<16x64xf32>
    %126 = tpu.matmul %124, %125, %cst_50 {dimension_numbers = #tpu.dot_dimension_numbers<[1], [0], [0], [1], [0, 0, 1, 1], [], []>} : vector<16x32xbf16>, vector<32x64xbf16>, vector<16x64xf32> -> vector<16x64xf32>
    %c0_51 = arith.constant 0 : index
    %c0_52 = arith.constant 0 : index
    %127 = vector.load %arg15[%c0_51, %c0_52] : memref<1x64xf32, #tpu.memory_space<vmem>>, vector<1x64xf32>
    %128 = vector.broadcast %127 : vector<1x64xf32> to vector<16x64xf32>
    %129 = arith.addf %126, %128 : vector<16x64xf32>
    %130 = arith.mulf %129, %129 : vector<16x64xf32>
    %131 = arith.mulf %129, %130 : vector<16x64xf32>
    %cst_53 = arith.constant 4.471500e-02 : f32
    %132 = vector.broadcast %cst_53 : f32 to vector<16x64xf32>
    %133 = arith.mulf %132, %131 : vector<16x64xf32>
    %134 = arith.addf %129, %133 : vector<16x64xf32>
    %cst_54 = arith.constant 0.797884583 : f32
    %135 = vector.broadcast %cst_54 : f32 to vector<16x64xf32>
    %136 = arith.mulf %135, %134 : vector<16x64xf32>
    %137 = math.tanh %136 : vector<16x64xf32>
    %cst_55 = arith.constant 1.000000e+00 : f32
    %138 = vector.broadcast %cst_55 : f32 to vector<16x64xf32>
    %139 = arith.addf %138, %137 : vector<16x64xf32>
    %cst_56 = arith.constant 5.000000e-01 : f32
    %140 = vector.broadcast %cst_56 : f32 to vector<16x64xf32>
    %141 = arith.mulf %140, %139 : vector<16x64xf32>
    %142 = arith.mulf %129, %141 : vector<16x64xf32>
    %143 = arith.truncf %142 : vector<16x64xf32> to vector<16x64xbf16>
    %c0_57 = arith.constant 0 : index
    %c0_58 = arith.constant 0 : index
    %144 = vector.load %arg16[%c0_57, %c0_58] : memref<64x32xbf16, #tpu.memory_space<vmem>>, vector<64x32xbf16>
    %cst_59 = arith.constant dense<0.000000e+00> : vector<16x32xf32>
    %145 = tpu.matmul %143, %144, %cst_59 {dimension_numbers = #tpu.dot_dimension_numbers<[1], [0], [0], [1], [0, 0, 1, 1], [], []>} : vector<16x64xbf16>, vector<64x32xbf16>, vector<16x32xf32> -> vector<16x32xf32>
    %c0_60 = arith.constant 0 : index
    %c0_61 = arith.constant 0 : index
    %146 = vector.load %arg17[%c0_60, %c0_61] : memref<1x32xf32, #tpu.memory_space<vmem>>, vector<1x32xf32>
    %147 = vector.broadcast %146 : vector<1x32xf32> to vector<16x32xf32>
    %148 = arith.addf %145, %147 : vector<16x32xf32>
    %149 = arith.addf %123, %148 : vector<16x32xf32>
    %cst_62 = arith.constant dense<0.000000e+00> : vector<16xf32>
    %150 = vector.multi_reduction <add>, %149, %cst_62 [1] : vector<16x32xf32> to vector<16xf32>
    %151 = vector.shape_cast %150 : vector<16xf32> to vector<16x1xf32>
    %cst_63 = arith.constant 3.200000e+01 : f32
    %152 = vector.broadcast %cst_63 : f32 to vector<16x1xf32>
    %153 = arith.divf %151, %152 : vector<16x1xf32>
    %154 = vector.broadcast %153 : vector<16x1xf32> to vector<16x32xf32>
    %155 = arith.subf %149, %154 : vector<16x32xf32>
    %156 = arith.mulf %155, %155 : vector<16x32xf32>
    %cst_64 = arith.constant dense<0.000000e+00> : vector<16xf32>
    %157 = vector.multi_reduction <add>, %156, %cst_64 [1] : vector<16x32xf32> to vector<16xf32>
    %158 = vector.shape_cast %157 : vector<16xf32> to vector<16x1xf32>
    %cst_65 = arith.constant 3.200000e+01 : f32
    %159 = vector.broadcast %cst_65 : f32 to vector<16x1xf32>
    %160 = arith.divf %158, %159 : vector<16x1xf32>
    %161 = vector.broadcast %153 : vector<16x1xf32> to vector<16x32xf32>
    %162 = arith.subf %149, %161 : vector<16x32xf32>
    %cst_66 = arith.constant 9.99999974E-6 : f32
    %163 = vector.broadcast %cst_66 : f32 to vector<16x1xf32>
    %164 = arith.addf %160, %163 : vector<16x1xf32>
    %165 = math.rsqrt %164 : vector<16x1xf32>
    %166 = vector.broadcast %165 : vector<16x1xf32> to vector<16x32xf32>
    %167 = arith.mulf %162, %166 : vector<16x32xf32>
    %c0_67 = arith.constant 0 : index
    %c0_68 = arith.constant 0 : index
    %168 = vector.load %arg12[%c0_67, %c0_68] : memref<1x32xf32, #tpu.memory_space<vmem>>, vector<1x32xf32>
    %169 = vector.broadcast %168 : vector<1x32xf32> to vector<16x32xf32>
    %170 = arith.mulf %167, %169 : vector<16x32xf32>
    %c0_69 = arith.constant 0 : index
    %c0_70 = arith.constant 0 : index
    %171 = vector.load %arg13[%c0_69, %c0_70] : memref<1x32xf32, #tpu.memory_space<vmem>>, vector<1x32xf32>
    %172 = vector.broadcast %171 : vector<1x32xf32> to vector<16x32xf32>
    %173 = arith.addf %170, %172 : vector<16x32xf32>
    %174 = arith.truncf %173 : vector<16x32xf32> to vector<16x32xbf16>
    %c0_71 = arith.constant 0 : index
    %c0_72 = arith.constant 0 : index
    %c0_73 = arith.constant 0 : index
    %175 = vector.load %arg18[%c0_71, %c0_72, %c0_73] : memref<1x16x32xbf16, #tpu.memory_space<vmem>>, vector<1x16x32xbf16>
    %176 = vector.shape_cast %175 : vector<1x16x32xbf16> to vector<16x32xbf16>
    %177 = vector.shape_cast %174 : vector<16x32xbf16> to vector<1x16x32xbf16>
    tpu.vector_store %arg18[%c0_71, %c0_72, %c0_73], %177 {strides = array<i32>} : memref<1x16x32xbf16, #tpu.memory_space<vmem>>, vector<1x16x32xbf16>,
    return
  }
  func.func @transform_0(%arg0: i32, %arg1: i32) -> (i32, i32, i32) {
    %c0_i32 = arith.constant 0 : i32
    %c0_i32_0 = arith.constant 0 : i32
    return %arg0, %arg1, %c0_i32 : i32, i32, i32
  }
  func.func @transform_1(%arg0: i32, %arg1: i32) -> (i32, i32, i32) {
    %c0_i32 = arith.constant 0 : i32
    %c0_i32_0 = arith.constant 0 : i32
    %c0_i32_1 = arith.constant 0 : i32
    return %arg0, %c0_i32, %c0_i32_0 : i32, i32, i32
  }
  func.func @transform_2(%arg0: i32, %arg1: i32) -> (i32, i32) {
    %c0_i32 = arith.constant 0 : i32
    %c0_i32_0 = arith.constant 0 : i32
    %c0_i32_1 = arith.constant 0 : i32
    return %c0_i32, %c0_i32_0 : i32, i32
  }
  func.func @transform_3(%arg0: i32, %arg1: i32) -> (i32, i32) {
    %c0_i32 = arith.constant 0 : i32
    %c0_i32_0 = arith.constant 0 : i32
    %c0_i32_1 = arith.constant 0 : i32
    return %c0_i32, %c0_i32_0 : i32, i32
  }
  func.func @transform_4(%arg0: i32, %arg1: i32) -> (i32, i32) {
    %c0_i32 = arith.constant 0 : i32
    %c0_i32_0 = arith.constant 0 : i32
    %c0_i32_1 = arith.constant 0 : i32
    return %c0_i32, %c0_i32_0 : i32, i32
  }
  func.func @transform_5(%arg0: i32, %arg1: i32) -> (i32, i32) {
    %c0_i32 = arith.constant 0 : i32
    %c0_i32_0 = arith.constant 0 : i32
    %c0_i32_1 = arith.constant 0 : i32
    return %c0_i32, %c0_i32_0 : i32, i32
  }
  func.func @transform_6(%arg0: i32, %arg1: i32) -> (i32, i32) {
    %c0_i32 = arith.constant 0 : i32
    %c0_i32_0 = arith.constant 0 : i32
    %c0_i32_1 = arith.constant 0 : i32
    return %c0_i32, %c0_i32_0 : i32, i32
  }
  func.func @transform_7(%arg0: i32, %arg1: i32) -> (i32, i32) {
    %c0_i32 = arith.constant 0 : i32
    %c0_i32_0 = arith.constant 0 : i32
    %c0_i32_1 = arith.constant 0 : i32
    return %c0_i32, %c0_i32_0 : i32, i32
  }
  func.func @transform_8(%arg0: i32, %arg1: i32) -> (i32, i32) {
    %c0_i32 = arith.constant 0 : i32
    %c0_i32_0 = arith.constant 0 : i32
    %c0_i32_1 = arith.constant 0 : i32
    return %c0_i32, %c0_i32_0 : i32, i32
  }
  func.func @transform_9(%arg0: i32, %arg1: i32) -> (i32, i32) {
    %c0_i32 = arith.constant 0 : i32
    %c0_i32_0 = arith.constant 0 : i32
    %c0_i32_1 = arith.constant 0 : i32
    return %c0_i32, %c0_i32_0 : i32, i32
  }
  func.func @transform_10(%arg0: i32, %arg1: i32) -> (i32, i32) {
    %c0_i32 = arith.constant 0 : i32
    %c0_i32_0 = arith.constant 0 : i32
    %c0_i32_1 = arith.constant 0 : i32
    return %c0_i32, %c0_i32_0 : i32, i32
  }
  func.func @transform_11(%arg0: i32, %arg1: i32) -> (i32, i32) {
    %c0_i32 = arith.constant 0 : i32
    %c0_i32_0 = arith.constant 0 : i32
    %c0_i32_1 = arith.constant 0 : i32
    return %c0_i32, %c0_i32_0 : i32, i32
  }
  func.func @transform_12(%arg0: i32, %arg1: i32) -> (i32, i32) {
    %c0_i32 = arith.constant 0 : i32
    %c0_i32_0 = arith.constant 0 : i32
    %c0_i32_1 = arith.constant 0 : i32
    return %c0_i32, %c0_i32_0 : i32, i32
  }
  func.func @transform_13(%arg0: i32, %arg1: i32) -> (i32, i32) {
    %c0_i32 = arith.constant 0 : i32
    %c0_i32_0 = arith.constant 0 : i32
    %c0_i32_1 = arith.constant 0 : i32
    return %c0_i32, %c0_i32_0 : i32, i32
  }
  func.func @transform_14(%arg0: i32, %arg1: i32) -> (i32, i32) {
    %c0_i32 = arith.constant 0 : i32
    %c0_i32_0 = arith.constant 0 : i32
    %c0_i32_1 = arith.constant 0 : i32
    return %c0_i32, %c0_i32_0 : i32, i32
  }
  func.func @transform_15(%arg0: i32, %arg1: i32) -> (i32, i32) {
    %c0_i32 = arith.constant 0 : i32
    %c0_i32_0 = arith.constant 0 : i32
    %c0_i32_1 = arith.constant 0 : i32
    return %c0_i32, %c0_i32_0 : i32, i32
  }
  func.func @transform_16(%arg0: i32, %arg1: i32) -> (i32, i32, i32) {
    %c0_i32 = arith.constant 0 : i32
    %c0_i32_0 = arith.constant 0 : i32
    return %arg0, %arg1, %c0_i32 : i32, i32, i32
  }
}

</mosaic_0001>

<bundles_post_ra>
// kernel: luna_matcher_forward.9
= control target key start
LH: loop header
LB: loop body
LE: loop exit
PB: predicated region body
PF: predicated region fallthrough
CT: control target
= control target key end

     0   :  { %9 = vsyncpa [#allocation3], 0  ;;  %s829_s0 = inlined_call_operand.vmem [shape: bf16[2,32,32], index: 0, kind: input, shape index: {}]   ;;  %s830_s1 = inlined_call_operand.vmem [shape: bf16[2,32,32], index: 1, kind: input, shape index: {}]   ;;  %s831_s2 = inlined_call_operand.vmem [shape: bf16[128,2], index: 2, kind: input, shape index: {}]   ;;  %s832_s3 = inlined_call_operand.vmem [shape: f32[1,2], index: 3, kind: input, shape index: {}]   ;;  %s833_s4 = inlined_call_operand.hbm [shape: f32[2,1,2], index: 4, kind: output, shape index: {}]  }
   0x1   :  { %11 = vsyncpa [#allocation3 + $0x1], 0  ;;  %s682_s15 = smov 0   ;;  %s684_s16 = smov 0  }
   0x2   :  { %s686_s17 = smov 0   ;;  %s688_s18 = smov 0  }
   0x3 LB: > { %s703_s19 = sadd.s32 4294967295, %s649_s18   ;;  %s469_s20 = sadd.s32 4294967294, %s649_s18   ;;  %s649_s18 = sphi %s688_s18, %s839_s18   ;;  %s645_s17 = sphi %s686_s17, %s838_s17   ;;  %s641_s16 = sphi %s684_s16, %s837_s16   ;;  %s637_s15 = sphi %s682_s15, %s836_s15  }
   0x4   : > { %s707_s21 = sadd.s32 1, %s649_s18   ;;  %s118_s22 = sadd.s32 1, %s645_s17 }
   0x5   : > { %s115_s23 = ssub.s32 %s649_s18, %s707_s21  ;;  %p128_p0 = scmp.ne.s32.totalorder %s645_s17, %s641_s16 }
   0x6   : > { %p116_p1 = scmp.eq.s32.totalorder %s115_s23, 0  ;;  %p129_p2 = scmp.eq.s32.totalorder %s703_s19, 1 }
   0x7   : > { %p134_p3 = scmp.ne.s32.totalorder %s641_s16, %s637_s15  ;;  %p135_p4 = scmp.eq.s32.totalorder %s469_s20, 1 }
   0x8   : > { %s718_s24 = scalar_select %p116_p1, %s645_s17, %s118_s22  }
   0x9   : > { %p720_p5 = por %p129_p2, %p128_p0  ;;  %p724_p6 = por %p135_p4, %p134_p3 }
   0xa   : > { %p472_p7 = scmp.ge.s32.totalorder %s649_s18, 1  ;;  %p175_p8 = scmp.lt.s32.totalorder %s649_s18, 3 }
   0xc   : > { %p176_p9 = pnand %p472_p7, %p175_p8 }
   0xd   : > { %p205_p10 = scmp.lt.s32.totalorder (!%p176_p9), %s703_s19, 1  ;;  %s653_s8 = smov (!%p176_p9), 32  }
   0xe   : > { %179 = sbr.rel (%p176_p9) target bundleno = 379 (0x17b), region = 36  ;;  %s655_s10 = smov (!%p176_p9), 64  }
   0xf   : > { %s203_s11 = sand.u32 (!%p176_p9), 1, %s641_s16   ;;  %s485_s14 = sshll.u32 (!%p176_p9), %s703_s19, 4 }
  0x10   : > { %s204_s20 = scalar_lea.vmem (!%p176_p9), [#allocation2], %s203_s11  ;;  %s788_s28 = scalar_lea.hbm (!%p176_p9), %s833_s4, %s485_s14 }
  0x11   : > { %s402_s22 = sshll.u32 (!%p176_p9), %s204_s20, 4  ;;  %s656_s30 = smov (!%p176_p9), [#allocation2]   ;;  %s790_s22 = int_to_ptr.vmem [resolvable:$true] %s402_s22 }
  0x12   : > { %s593_s5 = sshll.u32 (!%p176_p9), %s656_s30, 4  ;;  %s594_s5 = int_to_ptr.vmem [resolvable:$false] %s593_s5 }
  0x13   : > { %v651_v0 = vmov 0.0   ;;  %v581_v1 = vld [vmem:[%s831_s2 + $0x38] sm:$0xff]   ;;  %s206_s29 = scalar_select %p205_p10, %s703_s19, 1  ;;  %v582_v2 = vld [vmem:[%s831_s2 + $0x30] sm:$0xff]   ;;  %vm232_vm0 = vcmask 261120   ;;  %v583_v11 = vld [vmem:[%s831_s2 + $0x28] sm:$0xff]  }
  0x14   : > { %517 = vmatprep.subr.bf16.mxu0 %v651_v0  ;;  %v584_v25 = vld [vmem:[%s831_s2 + $0x20] sm:$0xff]   ;;  %v585_v31 = vld [vmem:[%s831_s2 + $0x18] sm:$0xff]   ;;  %v586_v36 = vld [vmem:[%s831_s2 + $0x10] sm:$0xff]   ;;  %vm652_vm1 = vmmov 0   ;;  %vm277_vm2 = vcmask 523264   ;;  %vm279_vm3 = vcmask 785408   ;;  %p596_p0 = scmp.lt.s32.totalorder %s790_s22, %s594_s5 }
  0x15   : > { %518 = vmatpush3.bf16.msra.mxu0 %v581_v1  ;;  %s488_s6 = sshll.u32 %s206_s29, 4  ;;  %v587_v41 = vld [vmem:[%s831_s2 + $0x8] sm:$0xff]   ;;  %533 = vmatprep.mubr.msk.bf16.mxu0 %vm652_vm1, %v651_v0  ;;  %v588_v46 = vld [vmem:[%s831_s2] sm:$0xff]   ;;  %vm387_vm4 = vcmask 8192   ;;  %s390_s29 = scalar_lea.sflag [#allocation3], %s203_s11 }
  0x16   : > { %519 = vmatprep.subr.bf16.mxu0 %v651_v0  ;;  %s214_s9 = scalar_lea.vmem %s830_s1, %s488_s6  ;;  %s209_s12 = scalar_lea.vmem %s829_s0, %s488_s6  ;;  %v298_v58 = vld [vmem:[%s832_s3] sm:$0x1] }
  0x17   : > { %v499_v3 = vld [vmem:[%s214_s9] sm:$0xff]   ;;  %v507_v4 = vld [vmem:[%s214_s9 + $0x8] sm:$0xff]   ;;  %s654_s9 = smov 96   ;;  %s589_s19 = scalar_lea.vmem %s790_s22, 16 }
  0x18   : > { %v491_v5 = vld [vmem:[%s209_s12] sm:$0xff]   ;;  %v500_v6 = vunpack.c.l.bf16 %v499_v3  ;;  %v501_v7 = vunpack.c.h.bf16 %v499_v3  ;;  %v504_v8 = vunpack.c.l.bf16 %v507_v4  ;;  %v505_v9 = vunpack.c.h.bf16 %v507_v4  ;;  %v506_v10 = vld [vmem:[%s209_s12 + $0x8] sm:$0xff]   ;;  %p590_p11 = scmp.ne.s32.totalorder %s790_s22, %s589_s19  ;;  %s595_s6 = scalar_lea.vmem %s594_s5, 32 }
  0x19   : > { %520 = vmatpush3.bf16.msra.mxu0 %v582_v2  ;;  %v492_v12 = vunpack.c.l.bf16 %v491_v5  ;;  %v493_v13 = vunpack.c.h.bf16 %v491_v5  ;;  %v496_v14 = vunpack.c.l.bf16 %v506_v10  ;;  %v497_v15 = vunpack.c.h.bf16 %v506_v10  ;;  %p597_p1 = scmp.lt.s32.totalorder %s595_s6, %s589_s19 }
  0x1a   : > { %521 = vmatprep.subr.bf16.mxu0 %v651_v0  ;;  %v248_v16 = vsel %vm232_vm0, %v500_v6, 0.0  ;;  %v249_v17 = vsel %vm232_vm0, %v501_v7, 0.0  ;;  %v251_v18 = vsel %vm232_vm0, %v504_v8, 0.0  ;;  %v253_v23 = vsel %vm232_vm0, %v505_v9, 0.0  ;;  %p591_p12 = pnand %p590_p11, %p720_p5 }
  0x1b   : > { %v250_v19 = vadd.f32 %v249_v17, %v248_v16  ;;  %v233_v20 = vsel %vm232_vm0, %v492_v12, 0.0  ;;  %v234_v21 = vsel %vm232_vm0, %v493_v13, 0.0  ;;  %v236_v22 = vsel %vm232_vm0, %v496_v14, 0.0  ;;  %p598_p2 = por %p597_p1, %p596_p0 }
  0x1c   : > { %v235_v24 = vadd.f32 %v234_v21, %v233_v20  ;;  %v238_v27 = vsel %vm232_vm0, %v497_v15, 0.0  ;;  %p592_p13 = pneg %p591_p12 }
  0x1d   : > { %522 = vmatpush3.bf16.msra.mxu0 %v583_v11  ;;  %v252_v26 = vadd.f32 %v251_v18, %v250_v19 }
  0x1e   : > { %523 = vmatprep.subr.bf16.mxu0 %v651_v0  ;;  %v237_v28 = vadd.f32 %v236_v22, %v235_v24  ;;  %p599_p3 = pnand %p598_p2, %p592_p13 }
  0x1f   : > { %v254_v29 = vadd.f32 %v253_v23, %v252_v26 }
  0x20   : > { %v239_v30 = vadd.f32 %v238_v27, %v237_v28 }
  0x21   : > { %524 = vmatpush3.bf16.msra.mxu0 %v584_v25  ;;  %v255_v32 = vrot.slane %v254_v29, 4 }
  0x22   : > { %525 = vmatprep.subr.bf16.mxu0 %v651_v0  ;;  %v240_v33 = vrot.slane %v239_v30, 4 }
  0x23   : > { %v256_v34 = vadd.f32 %v255_v32, %v254_v29 }
  0x24   : > { %v241_v35 = vadd.f32 %v240_v33, %v239_v30 }
  0x25   : > { %526 = vmatpush3.bf16.msra.mxu0 %v585_v31  ;;  %v257_v37 = vrot.slane %v256_v34, 2 }
  0x26   : > { %527 = vmatprep.subr.bf16.mxu0 %v651_v0  ;;  %v242_v38 = vrot.slane %v241_v35, 2 }
  0x27   : > { %v258_v39 = vadd.f32 %v257_v37, %v256_v34 }
  0x28   : > { %v243_v40 = vadd.f32 %v242_v38, %v241_v35 }
  0x29   : > { %528 = vmatpush3.bf16.msra.mxu0 %v586_v36  ;;  %v259_v42 = vrot.slane %v258_v39, 1 }
  0x2a   : > { %529 = vmatprep.subr.bf16.mxu0 %v651_v0  ;;  %v244_v43 = vrot.slane %v243_v40, 1 }
  0x2b   : > { %v260_v44 = vadd.f32 %v259_v42, %v258_v39 }
  0x2c   : > { %v245_v45 = vadd.f32 %v244_v43, %v243_v40 }
  0x2d   : > { %530 = vmatpush3.bf16.msra.mxu0 %v587_v41  ;;  %v261_v47 = vmul.f32 0.03125, %v260_v44 }
  0x2e   : > { %531 = vmatprep.subr.bf16.mxu0 %v651_v0  ;;  %v247_v48 = vmul.f32 0.03125, %v245_v45 }
  0x2f   : > { %265 = vrot.lane.b32.xlu0 %v261_v47, %s653_s8 }
  0x30   : > { %v262_v49 = vmul.f32 %v261_v47, %v247_v48  ;;  %v263_v50 = vsub.f32 %v247_v48, %v261_v47 }
  0x31   : > { %532 = vmatpush3.bf16.msra.mxu0 %v588_v46 }
  0x32   : > { %273 = vrot.lane.b32.xlu1 %v263_v50, %s654_s9 }
  0x33   : > { %269 = vrot.lane.b32.xlu0 %v262_v49, %s655_s10 }
  0xa1   : > { %v266_v51 = vpop.permute.xlu0 %265 }
  0xa2   : > { %v276_v53 = vsel %vm232_vm0, %v247_v48, %v266_v51 }
  0xa4   : > { %v274_v52 = vpop.permute.xlu1 %273 }
  0xa5   : > { %v270_v54 = vpop.permute.xlu0 %269 }
  0xa6   : > { %v278_v55 = vsel %vm277_vm2, %v276_v53, %v270_v54 }
  0xa7   : > { %v280_v56 = vsel %vm279_vm3, %v278_v55, %v274_v52 }
  0xa8   : > { %v281_v57 = vpack.c.bf16 %v280_v56, %v280_v56 }
  0xaa   : > { %534 = vmatmul.mubr.bf16.vlgmr.msra.gmra.mxu0 %v281_v57 }
 0x16a   : > { %v381_v59 = vpop.f32.mrf.mxu0 }
 0x16b   : > { %v382_v60 = vadd.f32 %v381_v59, %v298_v58 }
 0x16c   : > { %v535_v61 = vpop.f32.mrf.mxu0 }
 0x16d   : > { %388 = vst.msk [vmem:[%s204_s20] sm:$0x1] %vm387_vm4, %v382_v60 }
 0x16e   : > { %v384_v62 = vpop.f32.mrf.mxu0 }
 0x16f   : > { %602 = shalt.err (!%p599_p3)
}
 0x170   : > { %s603_s7 = scalar_lea.hbm %s788_s28, 16  ;;  %s607_s10 = scalar_lea.hbm %s833_s4, 32 }
 0x171   : > { %p604_p4 = scmp.ne.s32.totalorder %s788_s28, %s603_s7  ;;  %p608_p9 = scmp.lt.s32.totalorder %s788_s28, %s833_s4 }
 0x172   : > { %p609_p10 = scmp.lt.s32.totalorder %s607_s10, %s603_s7 }
 0x173   : > { %p605_p7 = pnand %p604_p4, %p720_p5 }
 0x174   : > { %p610_p11 = por %p609_p10, %p608_p9 }
 0x175   : > { %p606_p8 = pneg %p605_p7 }
 0x177   : > { %p611_p12 = pnand %p610_p11, %p606_p8 }
 0x179   : > { %614 = shalt.err (!%p611_p12)
}
 0x17a   : > { %537 = dma.vmem_to_hbm [thread:$0]  (%p720_p5), %s790_s22, 16, %s788_s28, %s390_s29   ;;  %v536_v63 = vpop.f32.mrf.mxu0 }
 0x17b PF: > { %p543_p13 = scmp.ge.s32.totalorder %s649_s18, 2  ;;  %s414_s13 = sand.u32 1, %s637_s15  }
 0x17c   : > { %s415_s14 = scalar_lea.sflag [#allocation3], %s414_s13 }
 0x17d   : > { %p540_p0 = pnand %p543_p13, %p724_p6 }
 0x17f   : > { %p541_p1 = pneg %p540_p0 }
 0x181   : > { %632 = dma.done.wait (%p541_p1), %s415_s14, 16  }
 0x182   : > { %634 = vsyncadd (%p541_p1), %s415_s14, 4294967280  ;;  %p14_p2 = scmp.ge.s32.totalorder %s707_s21, 4   ;;  %s836_s15 = smov %s641_s16 }
 0x183   : > { %s837_s16 = smov %s645_s17  ;;  %s838_s17 = smov %s718_s24 }
 0x184   : > { %s839_s18 = smov %s707_s21  ;;  %16 = sbr.rel (!%p14_p2) target bundleno = 3 (0x3), region = 74 }
 0x189   :  { %419 = vsyncpa [#allocation3], 1 }
 0x18a   :  { %421 = vsyncpa [#allocation3 + $0x1], 1 }

// kernel: luna_matcher_forward.5
= control target key start
LH: loop header
LB: loop body
LE: loop exit
PB: predicated region body
PF: predicated region fallthrough
CT: control target
= control target key end

     0   :  { %s1469_s13 = smov 0   ;;  %s1634_s0 = inlined_call_operand.vmem [shape: bf16[4,32,32], index: 0, kind: input, shape index: {}]   ;;  %s1635_s1 = inlined_call_operand.vmem [shape: bf16[4,8,32], index: 1, kind: input, shape index: {}, may-alias: {1,10}]   ;;  %s1636_s2 = inlined_call_operand.vmem [shape: bf16[32,32], index: 2, kind: input, shape index: {}]   ;;  %s1637_s3 = inlined_call_operand.vmem [shape: f32[1,32], index: 3, kind: input, shape index: {}]   ;;  %s1638_s4 = inlined_call_operand.vmem [shape: bf16[32,64], index: 4, kind: input, shape index: {}]   ;;  %s1639_s5 = inlined_call_operand.vmem [shape: f32[1,64], index: 5, kind: input, shape index: {}]   ;;  %s1640_s6 = inlined_call_operand.vmem [shape: bf16[32,32], index: 6, kind: input, shape index: {}]   ;;  %s1641_s7 = inlined_call_operand.vmem [shape: f32[1,32], index: 7, kind: input, shape index: {}]   ;;  %s1642_s8 = inlined_call_operand.vmem [shape: f32[1,32], index: 8, kind: input, shape index: {}]   ;;  %s1643_s9 = inlined_call_operand.vmem [shape: f32[1,32], index: 9, kind: input, shape index: {}]   ;;  %s1644_s10 = inlined_call_operand.vmem [shape: bf16[4,8,32], index: 10, kind: output, shape index: {}, may-alias: {1,10}]  }
   0x1 LB: > { %s1189_s14 = sadd.s32 4294967295, %s1400_s13   ;;  %p1193_p0 = scmp.ge.s32.totalorder %s1400_s13, 1  ;;  %s1400_s13 = sphi %s1469_s13, %s20_s13  }
   0x2   : > { %p321_p1 = scmp.lt.s32.totalorder %s1400_s13, 5 }
   0x4   : > { %p322_p2 = pnand %p1193_p0, %p321_p1 }
   0x5   : > { %p362_p3 = scmp.lt.s32.totalorder (!%p322_p2), %s1189_s14, 3  ;;  %s1404_s15 = smov (!%p322_p2), 96  }
   0x6   : > { %325 = sbr.rel (%p322_p2) target bundleno = 3140 (0xc44), region = 60  ;;  %s1405_s18 = smov (!%p322_p2), 120  }
   0x7   : > { %s1406_s19 = smov (!%p322_p2), 88   ;;  %s1407_s20 = smov (!%p322_p2), 112  }
   0x8   : > { %s1409_s22 = smov (!%p322_p2), 104   ;;  %s1410_s23 = smov (!%p322_p2), 72  }
   0x9   : > { %s1411_s25 = smov (!%p322_p2), 8   ;;  %s1412_s26 = smov (!%p322_p2), 16  }
   0xa   : > { %s1413_s11 = smov (!%p322_p2), 24  }
   0xb   : > { %v1368_v0 = vld [vmem:[%s1638_s4 + $0x8] sm:$0xff]   ;;  %v1369_v1 = vld [vmem:[%s1638_s4] sm:$0xff]   ;;  %s1646_s14 = smov (!%p362_p3, %s1189_s14), 3  ;;  %v1402_v2 = vmov 0.0   ;;  %vm404_vm0 = vcmask 261120   ;;  %vm1403_vm1 = vmmov 0  }
   0xc   : > { %1268 = vmatprep.subr.bf16.mxu1 %v1368_v0  ;;  %1260 = vmatprep.subr.bf16.mxu0 %v1402_v2  ;;  %v1372_v3 = vld [vmem:[%s1636_s2 + $0x8] sm:$0xff]   ;;  %s1225_s21 = sshll.u32 %s1646_s14, 4  ;;  %v1373_v4 = vld [vmem:[%s1636_s2] sm:$0xff]   ;;  %s1196_s24 = sshll.u32 %s1646_s14, 2  ;;  %vm539_vm2 = vcmask 64512   ;;  %vm1018_vm3 = vcmask 130048  }
   0xd   : > { %1269 = vmatpush3.bf16.msra.mxu1 %v1368_v0  ;;  %1264 = vmatprep.mubr.msk.bf16.mxu0 %vm1403_vm1, %v1402_v2  ;;  %s366_s27 = scalar_lea.vmem %s1634_s0, %s1225_s21  ;;  %s370_s30 = scalar_lea.vmem %s1635_s1, %s1196_s24  ;;  %v1202_v9 = vld [vmem:[%s1639_s5] ss:$0 sm:$0xff]  ;;  %vm1020_vm4 = vcmask 195584   ;;  %vm1122_vm5 = vcmask 257024  }
   0xe   : > { %1270 = vmatprep.subr.bf16.mxu1 %v1369_v1  ;;  %1261 = vmatpush3.bf16.msra.mxu0 %v1372_v3  ;;  %v1370_v5 = vld [vmem:[%s366_s27] sm:$0xff]   ;;  %v1371_v6 = vld [vmem:[%s366_s27 + $0x8] sm:$0xff]   ;;  %s1408_s21 = smov 80  }
   0xf   : > { %1262 = vmatprep.subr.bf16.mxu0 %v1402_v2  ;;  %1272 = vmatprep.mubr.msk.bf16.mxu1 %vm404_vm0, %v1370_v5  ;;  %v1507_v7 = vld [vmem:[%s370_s30] sm:$0xf] }
  0x10   : > { %v1198_v23 = vld [vmem:[%s1637_s3] ss:$0 sm:$0xff] }
  0x11   : > { %1271 = vmatpush3.bf16.msra.mxu1 %v1369_v1 }
  0x12   : > { %1284 = vmatprep.subr.bf16.mxu1 %v1402_v2  ;;  %1263 = vmatpush3.bf16.msra.mxu0 %v1373_v4 }
  0x13   : > { %1276 = vmatprep.subr.bf16.mxu0 %v1402_v2 }
  0x14   : > { %1273 = vmatmul.mubr.msk.bf16.vlgmr.msra.gmra.mxu1 %vm404_vm0, %v1371_v6 }
  0x15   : > { %1288 = vmatprep.mubr.msk.bf16.mxu1 %vm1403_vm1, %v1402_v2  ;;  %1265 = vmatmul.mubr.msk.bf16.vlgmr.msra.gmra.mxu0 %vm404_vm0, %v1507_v7 }
  0x16   : > { %1280 = vmatprep.mubr.msk.bf16.mxu0 %vm1403_vm1, %v1402_v2 }
  0xd4   : > { %v1274_v8 = vpop.f32.mrf.mxu1 }
  0xd5   : > { %v442_v11 = vpop.f32.mrf.mxu0  ;;  %v530_v14 = vadd.f32 %v1274_v8, %v1202_v9 }
  0xd6   : > { %v521_v10 = vpop.f32.mrf.mxu1  ;;  %v443_v25 = vadd.f32 %v1198_v23, %v442_v11 }
  0xd7   : > { %v1266_v13 = vpop.f32.mrf.mxu0  ;;  %v522_v21 = vadd.f32 %v1202_v9, %v521_v10 }
  0xd8   : > { %v1275_v12 = vpop.f32.mrf.mxu1  ;;  %v1532_v26 = vpack.c.bf16 %v443_v25, %v443_v25 }
  0xd9   : > { %v533_v15 = vadd.f32 %v1275_v12, %v1202_v9  ;;  %v445_v17 = vpop.f32.mrf.mxu0 }
  0xda   : > { %v524_v16 = vpop.f32.mrf.mxu1 }
  0xdb   : > { %v1520_v18 = vpack.c.bf16 %v533_v15, %v530_v14  ;;  %v525_v19 = vadd.f32 %v1202_v9, %v524_v16  ;;  %v1267_v20 = vpop.f32.mrf.mxu0 }
  0xdd   : > { %606 = vrot.lane.b32.xlu1 %v1520_v18, %s1404_s15  ;;  %v547_v22 = vsel %vm539_vm2, %v1520_v18, 0  ;;  %v1528_v24 = vpack.c.bf16 %v525_v19, %v522_v21 }
  0xde   : > { %1277 = vmatpush3.bf16.xpose.msra.mxu0 %v547_v22 }
  0xdf   : > { %1278 = vmatprep.subr.bf16.mxu0 %v1402_v2  ;;  %v544_v27 = vsel %vm539_vm2, %v1528_v24, 0 }
  0xe1   : > { %604 = vrot.lane.b32.xlu1 %v1528_v24, %s1404_s15 }
  0xe5   : > { %656 = vrot.lane.b32.xlu1 %v1528_v24, %s1405_s18 }
  0xe6   : > { %1279 = vmatpush3.bf16.xpose.msra.mxu0 %v544_v27 }
  0xe7   : > { %1300 = vmatprep.subr.bf16.mxu0 %v1402_v2 }
  0xe9   : > { %654 = vrot.lane.b32.xlu1 %v1532_v26, %s1405_s18 }
  0xed   : > { %1281 = vmatmul.mubr.msk.bf16.vlgmr.msra.gmra.mxu0 %vm539_vm2, %v1532_v26 }
  0xee   : > { %1304 = vmatprep.mubr.msk.bf16.mxu0 %vm1403_vm1, %v1402_v2 }
 0x14f   : > { %v607_v28 = vpop.permute.xlu1 %606 }
 0x150   : > { %1285 = vmatpush3.bf16.msra.mxu1 %v607_v28 }
 0x151   : > { %1286 = vmatprep.subr.bf16.mxu1 %v1402_v2 }
 0x153   : > { %v605_v29 = vpop.permute.xlu1 %604 }
 0x154   : > { %1287 = vmatpush3.bf16.msra.mxu1 %v605_v29 }
 0x155   : > { %1292 = vmatprep.subr.bf16.mxu1 %v1402_v2 }
 0x157   : > { %v657_v47 = vpop.permute.xlu1 %656 }
 0x158   : > { %v664_v48 = vsel %vm539_vm2, %v657_v47, 0 }
 0x15b   : > { %v655_v49 = vpop.permute.xlu1 %654 }
 0x1ad   : > { %v583_v30 = vpop.f32.mrf.mxu0 }
 0x1ae   : > { %v589_v31 = vmul.f32 0.35355338, %v583_v30 }
 0x1af   : > { %v1282_v32 = vpop.f32.mrf.mxu0 }
 0x1b0   : > { %v590_v33 = vsel %vm404_vm0, %v589_v31, -inf }
 0x1b1   : > { %591 = vmax.xlane.f32.xlu0 %v590_v33  ;;  %v586_v34 = vpop.f32.mrf.mxu0 }
 0x1b3   : > { %v1283_v35 = vpop.f32.mrf.mxu0 }
 0x23a   : > { %v592_v36 = vpop.xlane.xlu0 %591 }
 0x23b   : > { %v593_v37 = vsub.f32 %v589_v31, %v592_v36 }
 0x23d   : > { %v594_v38 = vmul.f32 1.442695, %v593_v37 }
 0x23f   : > { %1376 = vpow2.f32 %v594_v38 }
 0x24c   : > { %v1377_v39 = vpop.eup %1376 }
 0x24d   : > { %v596_v40 = vsel %vm404_vm0, %v1377_v39, 0.0 }
 0x24e   : > { %597 = vadd.xlane.f32.xlu0 %v596_v40 }
 0x264   : > { %658 = vrot.lane.b32.xlu0 %v1520_v18, %s1405_s18 }
 0x2d7   : > { %v598_v41 = vpop.xlane.xlu0 %597 }
 0x2d8   : > { %1378 = vrcp.f32 %v598_v41 }
 0x2db   : > { %v659_v44 = vpop.permute.xlu0 %658 }
 0x2dc   : > { %v667_v46 = vsel %vm539_vm2, %v659_v44, 0 }
 0x2e5   : > { %v1379_v42 = vpop.eup %1378 }
 0x2e6   : > { %v600_v43 = vmul.f32 %v1379_v42, %v1377_v39 }
 0x2e8   : > { %v601_v45 = vpack.c.bf16 %v600_v43, %v600_v43 }
 0x2ea   : > { %1289 = vmatmul.mubr.msk.bf16.vlgmr.msra.gmra.mxu1 %vm404_vm0, %v601_v45 }
 0x2eb   : > { %1293 = vmatpush3.bf16.xpose.msra.mxu1 %v667_v46  ;;  %1296 = vmatprep.mubr.msk.bf16.mxu1 %vm1403_vm1, %v1402_v2 }
 0x2ec   : > { %1294 = vmatprep.subr.bf16.mxu1 %v1402_v2 }
 0x2f3   : > { %1295 = vmatpush3.bf16.xpose.msra.mxu1 %v664_v48 }
 0x2f4   : > { %1316 = vmatprep.subr.bf16.mxu1 %v1402_v2 }
 0x2fa   : > { %1297 = vmatmul.mubr.msk.bf16.vlgmr.msra.gmra.mxu1 %vm539_vm2, %v655_v49 }
 0x2fb   : > { %1320 = vmatprep.mubr.msk.bf16.mxu1 %vm1403_vm1, %v1402_v2 }
 0x3aa   : > { %v1558_v50 = vpop.f32.mrf.mxu1 }
 0x3ac   : > { %v1290_v51 = vpop.f32.mrf.mxu1 }
 0x3ae   : > { %v650_v52 = vpop.f32.mrf.mxu1 }
 0x3b0   : > { %v1291_v53 = vpop.f32.mrf.mxu1 }
 0x3ba   : > { %v703_v54 = vpop.f32.mrf.mxu1 }
 0x3bb   : > { %v709_v55 = vmul.f32 0.35355338, %v703_v54 }
 0x3bc   : > { %v1298_v56 = vpop.f32.mrf.mxu1 }
 0x3bd   : > { %v710_v57 = vsel %vm404_vm0, %v709_v55, -inf }
 0x3be   : > { %711 = vmax.xlane.f32.xlu1 %v710_v57  ;;  %v706_v58 = vpop.f32.mrf.mxu1 }
 0x3c0   : > { %v1299_v59 = vpop.f32.mrf.mxu1 }
 0x3cf   : > { %724 = vrot.lane.b32.xlu1 %v1520_v18, %s1406_s19 }
 0x3d3   : > { %775 = vrot.lane.b32.xlu1 %v1520_v18, %s1407_s20 }
 0x3d7   : > { %773 = vrot.lane.b32.xlu1 %v1528_v24, %s1407_s20 }
 0x3db   : > { %771 = vrot.lane.b32.xlu1 %v1532_v26, %s1407_s20 }
 0x447   : > { %v712_v60 = vpop.xlane.xlu1 %711 }
 0x448   : > { %v713_v61 = vsub.f32 %v709_v55, %v712_v60 }
 0x44a   : > { %v714_v62 = vmul.f32 1.442695, %v713_v61 }
 0x44b   : > { %v725_v63 = vpop.permute.xlu1 %724 }
 0x44c   : > { %1380 = vpow2.f32 %v714_v62  ;;  %1301 = vmatpush3.bf16.msra.mxu0 %v725_v63  ;;  %v1375_v63 = vld [vmem:[%s1640_s6] sm:$0xff]  }
 0x44d   : > { %1302 = vmatprep.subr.bf16.mxu0 %v1402_v2 }
 0x44f   : > { %v776_v8 = vpop.permute.xlu1 %775 }
 0x450   : > { %v784_v10 = vsel %vm539_vm2, %v776_v8, 0 }
 0x453   : > { %v774_v11 = vpop.permute.xlu1 %773 }
 0x454   : > { %v781_v12 = vsel %vm539_vm2, %v774_v11, 0 }
 0x457   : > { %v772_v13 = vpop.permute.xlu1 %771 }
 0x459   : > { %v1381_v0 = vpop.eup %1380 }
 0x45a   : > { %v716_v1 = vsel %vm404_vm0, %v1381_v0, 0.0 }
 0x45b   : > { %717 = vadd.xlane.f32.xlu0 %v716_v1 }
 0x471   : > { %722 = vrot.lane.b32.xlu0 %v1528_v24, %s1406_s19 }
 0x4e4   : > { %v718_v3 = vpop.xlane.xlu0 %717 }
 0x4e5   : > { %1382 = vrcp.f32 %v718_v3 }
 0x4e8   : > { %v723_v4 = vpop.permute.xlu0 %722 }
 0x4e9   : > { %1303 = vmatpush3.bf16.msra.mxu0 %v723_v4 }
 0x4ea   : > { %1308 = vmatprep.subr.bf16.mxu0 %v1402_v2 }
 0x4f2   : > { %v1383_v5 = vpop.eup %1382 }
 0x4f3   : > { %v720_v6 = vmul.f32 %v1383_v5, %v1381_v0 }
 0x4f5   : > { %v721_v9 = vpack.c.bf16 %v720_v6, %v720_v6 }
 0x4f7   : > { %1305 = vmatmul.mubr.msk.bf16.vlgmr.msra.gmra.mxu0 %vm404_vm0, %v721_v9 }
 0x4f8   : > { %1309 = vmatpush3.bf16.xpose.msra.mxu0 %v784_v10  ;;  %1312 = vmatprep.mubr.msk.bf16.mxu0 %vm1403_vm1, %v1402_v2 }
 0x4f9   : > { %1310 = vmatprep.subr.bf16.mxu0 %v1402_v2 }
 0x500   : > { %1311 = vmatpush3.bf16.xpose.msra.mxu0 %v781_v12 }
 0x501   : > { %1332 = vmatprep.subr.bf16.mxu0 %v1402_v2 }
 0x507   : > { %1313 = vmatmul.mubr.msk.bf16.vlgmr.msra.gmra.mxu0 %vm539_vm2, %v772_v13  ;;  %v1089_v13 = vunpack.c.l.bf16 %v1507_v7 }
 0x508   : > { %1336 = vmatprep.mubr.msk.bf16.mxu0 %vm1403_vm1, %v1402_v2 }
 0x5b7   : > { %v765_v14 = vpop.f32.mrf.mxu0 }
 0x5b9   : > { %v1306_v15 = vpop.f32.mrf.mxu0 }
 0x5bb   : > { %v768_v16 = vpop.f32.mrf.mxu0 }
 0x5bd   : > { %v1307_v17 = vpop.f32.mrf.mxu0 }
 0x5c7   : > { %v820_v19 = vpop.f32.mrf.mxu0 }
 0x5c8   : > { %v826_v20 = vmul.f32 0.35355338, %v820_v19 }
 0x5c9   : > { %v1314_v21 = vpop.f32.mrf.mxu0 }
 0x5ca   : > { %v827_v22 = vsel %vm404_vm0, %v826_v20, -inf }
 0x5cb   : > { %828 = vmax.xlane.f32.xlu1 %v827_v22  ;;  %v823_v23 = vpop.f32.mrf.mxu0 }
 0x5cd   : > { %v1315_v25 = vpop.f32.mrf.mxu0 }
 0x5dc   : > { %839 = vrot.lane.b32.xlu1 %v1528_v24, %s1408_s21 }
 0x5e0   : > { %892 = vrot.lane.b32.xlu1 %v1520_v18, %s1409_s22 }
 0x5e4   : > { %888 = vrot.lane.b32.xlu1 %v1532_v26, %s1409_s22 }
 0x654   : > { %v829_v27 = vpop.xlane.xlu1 %828 }
 0x655   : > { %v830_v28 = vsub.f32 %v826_v20, %v829_v27 }
 0x657   : > { %v831_v29 = vmul.f32 1.442695, %v830_v28 }
 0x658   : > { %v840_v34 = vpop.permute.xlu1 %839 }
 0x659   : > { %1384 = vpow2.f32 %v831_v29 }
 0x65c   : > { %v893_v36 = vpop.permute.xlu1 %892 }
 0x65d   : > { %v901_v38 = vsel %vm539_vm2, %v893_v36, 0 }
 0x660   : > { %v889_v41 = vpop.permute.xlu1 %888 }
 0x666   : > { %v1385_v30 = vpop.eup %1384 }
 0x667   : > { %v833_v31 = vsel %vm404_vm0, %v1385_v30, 0.0 }
 0x668   : > { %834 = vadd.xlane.f32.xlu0 %v833_v31  ;;  %v1221_v31 = vld [vmem:[%s1642_s8] ss:$0 sm:$0xff] }
 0x67e   : > { %841 = vrot.lane.b32.xlu0 %v1520_v18, %s1408_s21 }
 0x682   : > { %890 = vrot.lane.b32.xlu0 %v1528_v24, %s1409_s22  ;;  %s374_s22 = scalar_lea.vmem %s1644_s10, %s1196_s24 }
 0x6f1   : > { %v835_v32 = vpop.xlane.xlu0 %834 }
 0x6f2   : > { %1386 = vrcp.f32 %v835_v32 }
 0x6f5   : > { %v842_v33 = vpop.permute.xlu0 %841 }
 0x6f6   : > { %1317 = vmatpush3.bf16.msra.mxu1 %v842_v33  ;;  %v1222_v33 = vld [vmem:[%s1643_s9] ss:$0 sm:$0xff] }
 0x6f7   : > { %1318 = vmatprep.subr.bf16.mxu1 %v1402_v2 }
 0x6f9   : > { %v891_v39 = vpop.permute.xlu0 %890 }
 0x6fa   : > { %1319 = vmatpush3.bf16.msra.mxu1 %v840_v34  ;;  %v898_v40 = vsel %vm539_vm2, %v891_v39, 0 }
 0x6fb   : > { %1324 = vmatprep.subr.bf16.mxu1 %v1402_v2 }
 0x6ff   : > { %v1387_v26 = vpop.eup %1386 }
 0x700   : > { %v837_v35 = vmul.f32 %v1387_v26, %v1385_v30 }
 0x702   : > { %v838_v37 = vpack.c.bf16 %v837_v35, %v837_v35 }
 0x704   : > { %1321 = vmatmul.mubr.msk.bf16.vlgmr.msra.gmra.mxu1 %vm404_vm0, %v838_v37 }
 0x705   : > { %1325 = vmatpush3.bf16.xpose.msra.mxu1 %v901_v38  ;;  %1328 = vmatprep.mubr.msk.bf16.mxu1 %vm1403_vm1, %v1402_v2 }
 0x706   : > { %1326 = vmatprep.subr.bf16.mxu1 %v1402_v2 }
 0x70d   : > { %1327 = vmatpush3.bf16.xpose.msra.mxu1 %v898_v40 }
 0x714   : > { %1329 = vmatmul.mubr.msk.bf16.vlgmr.msra.gmra.mxu1 %vm539_vm2, %v889_v41 }
 0x7c4   : > { %v882_v42 = vpop.f32.mrf.mxu1 }
 0x7c6   : > { %v1322_v43 = vpop.f32.mrf.mxu1 }
 0x7c8   : > { %v885_v44 = vpop.f32.mrf.mxu1 }
 0x7ca   : > { %v1323_v45 = vpop.f32.mrf.mxu1 }
 0x7d4   : > { %v937_v46 = vpop.f32.mrf.mxu1 }
 0x7d5   : > { %v943_v47 = vmul.f32 0.35355338, %v937_v46 }
 0x7d6   : > { %v1330_v48 = vpop.f32.mrf.mxu1 }
 0x7d7   : > { %v944_v49 = vsel %vm404_vm0, %v943_v47, -inf }
 0x7d8   : > { %945 = vmax.xlane.f32.xlu0 %v944_v49  ;;  %v940_v51 = vpop.f32.mrf.mxu1 }
 0x7da   : > { %v1331_v52 = vpop.f32.mrf.mxu1 }
 0x7ee   : > { %958 = vrot.lane.b32.xlu0 %v1520_v18, %s1410_s23 }
 0x7f2   : > { %1006 = vrot.lane.b32.xlu0 %v765_v14, %s1411_s25 }
 0x861   : > { %v946_v53 = vpop.xlane.xlu0 %945 }
 0x862   : > { %v947_v54 = vsub.f32 %v943_v47, %v946_v53 }
 0x864   : > { %v948_v55 = vmul.f32 1.442695, %v947_v54 }
 0x865   : > { %v959_v56 = vpop.permute.xlu0 %958 }
 0x866   : > { %1388 = vpow2.f32 %v948_v55  ;;  %1333 = vmatpush3.bf16.msra.mxu0 %v959_v56 }
 0x867   : > { %1334 = vmatprep.subr.bf16.mxu0 %v1402_v2 }
 0x869   : > { %v1007_v5 = vpop.permute.xlu0 %1006 }
 0x86a   : > { %v1017_v8 = vsel %vm539_vm2, %v1558_v50, %v1007_v5 }
 0x873   : > { %v1389_v57 = vpop.eup %1388 }
 0x874   : > { %v950_v58 = vsel %vm404_vm0, %v1389_v57, 0.0 }
 0x875   : > { %951 = vadd.xlane.f32.xlu1 %v950_v58 }
 0x886   : > { %956 = vrot.lane.b32.xlu1 %v1528_v24, %s1410_s23  ;;  %v1374_v24 = vld [vmem:[%s1640_s6 + $0x8] sm:$0xff]  }
 0x88a   : > { %1010 = vrot.lane.b32.xlu1 %v882_v42, %s1412_s26 }
 0x8fe   : > { %v952_v59 = vpop.xlane.xlu1 %951 }
 0x8ff   : > { %1390 = vrcp.f32 %v952_v59 }
 0x902   : > { %v957_v18 = vpop.permute.xlu1 %956 }
 0x903   : > { %1335 = vmatpush3.bf16.msra.mxu0 %v957_v18 }
 0x904   : > { %1340 = vmatprep.subr.bf16.mxu0 %v1402_v2 }
 0x906   : > { %v1011_v6 = vpop.permute.xlu1 %1010 }
 0x907   : > { %v1019_v9 = vsel %vm1018_vm3, %v1017_v8, %v1011_v6 }
 0x90c   : > { %v1391_v60 = vpop.eup %1390 }
 0x90d   : > { %v954_v61 = vmul.f32 %v1391_v60, %v1389_v57 }
 0x90f   : > { %v955_v62 = vpack.c.bf16 %v954_v61, %v954_v61 }
 0x911   : > { %1337 = vmatmul.mubr.msk.bf16.vlgmr.msra.gmra.mxu0 %vm404_vm0, %v955_v62 }
 0x912   : > { %1344 = vmatprep.mubr.msk.bf16.mxu0 %vm1403_vm1, %v1402_v2  ;;  %1341 = vmatpush3.bf16.msra.mxu0 %v1374_v24 }
 0x913   : > { %1342 = vmatprep.subr.bf16.mxu0 %v1402_v2  ;;  %v1217_v2 = vld [vmem:[%s1641_s7] ss:$0 sm:$0xff] }
 0x916   : > { %1343 = vmatpush3.bf16.msra.mxu0 %v1375_v63 }
 0x9d1   : > { %v999_v0 = vpop.f32.mrf.mxu0 }
 0x9d2   : > { %1014 = vrot.lane.b32.xlu0 %v999_v0, %s1413_s11 }
 0x9d3   : > { %v1338_v1 = vpop.f32.mrf.mxu0 }
 0x9d5   : > { %v1002_v3 = vpop.f32.mrf.mxu0 }
 0x9d7   : > { %v1339_v4 = vpop.f32.mrf.mxu0 }
 0xa44   : > { %v1015_v10 = vpop.permute.xlu0 %1014 }
 0xa45   : > { %v1021_v11 = vsel %vm1020_vm4, %v1019_v9, %v1015_v10 }
 0xa46   : > { %v1022_v12 = vpack.c.bf16 %v1021_v11, %v1021_v11 }
 0xa48   : > { %1345 = vmatmul.mubr.msk.bf16.vlgmr.msra.gmra.mxu0 %vm404_vm0, %v1022_v12 }
 0xb08   : > { %v1083_v14 = vpop.f32.mrf.mxu0 }
 0xb09   : > { %v1084_v15 = vadd.f32 %v1217_v2, %v1083_v14 }
 0xb0a   : > { %v1346_v16 = vpop.f32.mrf.mxu0 }
 0xb0b   : > { %v1090_v17 = vadd.f32 %v1089_v13, %v1084_v15 }
 0xb0c   : > { %v1086_v19 = vpop.f32.mrf.mxu0 }
 0xb0d   : > { %v1091_v20 = vsel %vm404_vm0, %v1090_v17, 0.0 }
 0xb0e   : > { %1092 = vadd.xlane.f32.xlu1 %v1091_v20  ;;  %v1347_v50 = vpop.f32.mrf.mxu0 }
 0xb97   : > { %v1093_v21 = vpop.xlane.xlu1 %1092 }
 0xb98   : > { %v1095_v22 = vmul.f32 0.03125, %v1093_v21 }
 0xb9a   : > { %v1096_v23 = vsub.f32 %v1090_v17, %v1095_v22 }
 0xb9c   : > { %v1097_v25 = vmul.f32 %v1096_v23, %v1096_v23 }
 0xb9e   : > { %v1098_v27 = vsel %vm404_vm0, %v1097_v25, 0.0 }
 0xb9f   : > { %1099 = vadd.xlane.f32.xlu0 %v1098_v27 }
 0xc28   : > { %v1100_v28 = vpop.xlane.xlu0 %1099 }
 0xc29   : > { %v1101_v29 = vmul.f32 0.03125, %v1100_v28 }
 0xc2b   : > { %v1102_v7 = vadd.f32 1e-05, %v1101_v29 }
 0xc2d   : > { %1392 = vrsqrt.f32 %v1102_v7 }
 0xc3a   : > { %v1393_v30 = vpop.eup %1392 }
 0xc3b   : > { %v1104_v32 = vmul.f32 %v1393_v30, %v1096_v23 }
 0xc3d   : > { %v1112_v34 = vmul.f32 %v1221_v31, %v1104_v32 }
 0xc3f   : > { %v1120_v26 = vadd.f32 %v1222_v33, %v1112_v34 }
 0xc41   : > { %v1121_v35 = vpack.c.bf16 %v1120_v26, %v1120_v26 }
 0xc43   : > { %1123 = vst.msk [vmem:[%s374_s22] sm:$0xf] %vm1122_vm5, %v1121_v35 }
 0xc44 PF: > { %s20_s13 = sadd.s32 1, %s1400_s13  }
 0xc45   : > { %p17_p4 = scmp.ge.s32.totalorder %s20_s13, 6  }
 0xc47   :  { %19 = sbr.rel (!%p17_p4) target bundleno = 1 (0x1), region = 93 }

// kernel: luna_matcher_forward.6
= control target key start
LH: loop header
LB: loop body
LE: loop exit
PB: predicated region body
PF: predicated region fallthrough
CT: control target
= control target key end

     0   :  { %s2142_s21 = smov 0   ;;  %s2144_s22 = smov 0   ;;  %s2388_s0 = inlined_call_operand.vmem [shape: bf16[4,32,32], index: 0, kind: input, shape index: {}, may-alias: {0,16}]   ;;  %s2389_s1 = inlined_call_operand.vmem [shape: bf16[4,8,32], index: 1, kind: input, shape index: {}]   ;;  %s2390_s2 = inlined_call_operand.vmem [shape: bf16[32,32], index: 2, kind: input, shape index: {}]   ;;  %s2391_s3 = inlined_call_operand.vmem [shape: f32[1,32], index: 3, kind: input, shape index: {}]   ;;  %s2392_s4 = inlined_call_operand.vmem [shape: bf16[32,64], index: 4, kind: input, shape index: {}]   ;;  %s2393_s5 = inlined_call_operand.vmem [shape: f32[1,64], index: 5, kind: input, shape index: {}]   ;;  %s2394_s6 = inlined_call_operand.vmem [shape: bf16[32,32], index: 6, kind: input, shape index: {}]   ;;  %s2395_s7 = inlined_call_operand.vmem [shape: f32[1,32], index: 7, kind: input, shape index: {}]   ;;  %s2396_s8 = inlined_call_operand.vmem [shape: f32[1,32], index: 8, kind: input, shape index: {}]   ;;  %s2397_s9 = inlined_call_operand.vmem [shape: f32[1,32], index: 9, kind: input, shape index: {}]   ;;  %s2398_s10 = inlined_call_operand.vmem [shape: f32[1,32], index: 10, kind: input, shape index: {}]   ;;  %s2399_s11 = inlined_call_operand.vmem [shape: f32[1,32], index: 11, kind: input, shape index: {}]   ;;  %s2400_s12 = inlined_call_operand.vmem [shape: bf16[32,64], index: 12, kind: input, shape index: {}]   ;;  %s2401_s13 = inlined_call_operand.vmem [shape: f32[1,64], index: 13, kind: input, shape index: {}]   ;;  %s2402_s14 = inlined_call_operand.vmem [shape: bf16[64,32], index: 14, kind: input, shape index: {}]   ;;  %s2403_s15 = inlined_call_operand.vmem [shape: f32[1,32], index: 15, kind: input, shape index: {}]   ;;  %s2404_s16 = inlined_call_operand.vmem [shape: bf16[4,32,32], index: 16, kind: output, shape index: {}, may-alias: {0,16}]  }
   0x1   :  { %2405 = sst [smem:[#allocation2_spill]] %s2388_s0  ;;  %s2146_s23 = smov 0  }
   0x2   :  { %2406 = sst [smem:[#allocation3_spill]] %s2390_s2  ;;  %s2148_s24 = smov 0  }
   0x3   :  { %s2150_s25 = smov 0  }
   0x4 LB: > { %s35_s26 = sadd.s32 1, %s2035_s23  ;;  %s38_s27 = sadd.s32 1, %s2039_s24  ;;  %s2043_s25 = sphi %s2150_s25, %s26_s25   ;;  %s2039_s24 = sphi %s2148_s24, %s2412_s24   ;;  %s2035_s23 = sphi %s2146_s23, %s2411_s23   ;;  %s2031_s22 = sphi %s2144_s22, %s2410_s22   ;;  %s2027_s21 = sphi %s2142_s21, %s2409_s21  }
   0x5   : > { %p36_p0 = scmp.ge.s32.totalorder %s35_s26, 2  ;;  %p1706_p1 = scmp.ge.s32.totalorder %s2043_s25, 1 }
   0x6   : > { %p492_p2 = scmp.lt.s32.totalorder %s2043_s25, 9 }
   0x7   : > { %s2414_s26 = smov (%p36_p0, %s35_s26), 0  ;;  %s2416_s27 = smov (!%p36_p0, %s38_s27), %s2039_s24 }
   0x8   : > { %p493_p3 = pnand %p1706_p1, %p492_p2  ;;  %p40_p4 = scmp.ge.s32.totalorder %s2416_s27, 4 }
   0x9   : > { %s2407_s2 = sld [smem:[#allocation3_spill]] (!%p493_p3)  ;;  %s1707_s17 = sshll.u32 (!%p493_p3), %s2027_s21, 1 }
   0xa   : > { %s2418_s27 = smov (%p40_p4, %s2416_s27), 0  ;;  %496 = sbr.rel (%p493_p3) target bundleno = 2460 (0x99c), region = 84 }
   0xb   : > { %p555_p5 = scmp.lt.s32.totalorder (!%p493_p3), %s2031_s22, 3  ;;  %p557_p6 = scmp.lt.s32.totalorder (!%p493_p3), %s1707_s17, 3 }
   0xc   : > { %s2408_s0 = sld [smem:[#allocation2_spill]] (!%p493_p3)  ;;  %s2049_s28 = smov (!%p493_p3), 104  }
   0xd   : > { %s2050_s21 = smov (!%p493_p3), 96   ;;  %s2053_s30 = smov (!%p493_p3), 88  }
   0xf   : > { %v1947_v0 = vld [vmem:[%s2407_s2 + $0x8] sm:$0xff]   ;;  %v2045_v1 = vmov 0.0   ;;  %v1948_v2 = vld [vmem:[%s2407_s2] sm:$0xff]   ;;  %vm2046_vm0 = vmmov 0   ;;  %s2420_s22 = smov (!%p555_p5, %s2031_s22), 3  ;;  %s2422_s17 = smov (!%p557_p6, %s1707_s17), 3 }
  0x10   : > { %1788 = vmatprep.subr.bf16.mxu1 %v2045_v1  ;;  %1804 = vmatprep.subr.bf16.mxu0 %v2045_v1  ;;  %s1708_s18 = sshll.u32 %s2420_s22, 2  ;;  %v1950_v3 = vld [vmem:[%s2392_s4 + $0x8] sm:$0xff]   ;;  %vm610_vm1 = vcmask 261120   ;;  %v1951_v5 = vld [vmem:[%s2392_s4] sm:$0xff]   ;;  %vm723_vm2 = vcmask 64512   ;;  %s2047_s22 = smov 112  }
  0x11   : > { %1789 = vmatpush3.bf16.msra.mxu1 %v1947_v0  ;;  %1792 = vmatprep.mubr.msk.bf16.mxu1 %vm2046_vm0, %v2045_v1  ;;  %s2188_s19 = sadd.s32 %s1708_s18, %s2422_s17  ;;  %s567_s29 = scalar_lea.vmem %s2389_s1, %s1708_s18  ;;  %v1719_v11 = vld [vmem:[%s2393_s5] ss:$0 sm:$0xff]  ;;  %vm802_vm3 = vcmask 1043456   ;;  %vm1249_vm4 = vcmask 130048   ;;  %vm1252_vm5 = vcmask 195584   ;;  %vm1498_vm6 = vcmask 523264  }
  0x12   : > { %1790 = vmatprep.subr.bf16.mxu1 %v2045_v1  ;;  %1806 = vmatprep.mubr.msk.bf16.mxu0 %vm2046_vm0, %v2045_v1  ;;  %s1709_s20 = sshll.u32 %s2188_s19, 2  ;;  %v581_v6 = vld [vmem:[%s567_s29] sm:$0xf]  ;;  %s2048_s17 = smov 120   ;;  %vm1597_vm7 = vcmask 257024  }
  0x13   : > { %s562_s2 = scalar_lea.vmem %s2408_s0, %s1709_s20  ;;  %v1714_v14 = vld [vmem:[%s2391_s3] ss:$0 sm:$0xff]  ;;  %s2051_s29 = smov 80  }
  0x14   : > { %v2200_v4 = vld [vmem:[%s562_s2] sm:$0xff]   ;;  %s2052_s2 = smov 72  }
  0x15   : > { %1791 = vmatpush3.bf16.msra.mxu1 %v1948_v2 }
  0x16   : > { %1796 = vmatprep.subr.bf16.mxu1 %v2045_v1 }
  0x18   : > { %1793 = vmatmul.mubr.msk.bf16.vlgmr.msra.gmra.mxu1 %vm610_vm1, %v2200_v4 }
  0x19   : > { %1797 = vmatpush3.bf16.msra.mxu1 %v1950_v3  ;;  %1800 = vmatprep.mubr.msk.bf16.mxu1 %vm2046_vm0, %v2045_v1 }
  0x1a   : > { %1798 = vmatprep.subr.bf16.mxu1 %v2045_v1 }
  0x1d   : > { %1799 = vmatpush3.bf16.msra.mxu1 %v1951_v5 }
  0x1e   : > { %1810 = vmatprep.subr.bf16.mxu1 %v2045_v1 }
  0x20   : > { %1801 = vmatmul.mubr.msk.bf16.vlgmr.msra.gmra.mxu1 %vm610_vm1, %v581_v6 }
  0x21   : > { %1812 = vmatprep.mubr.msk.bf16.mxu1 %vm2046_vm0, %v2045_v1 }
  0xd8   : > { %v648_v7 = vpop.f32.mrf.mxu1 }
  0xd9   : > { %v649_v19 = vadd.f32 %v1714_v14, %v648_v7 }
  0xda   : > { %v1794_v8 = vpop.f32.mrf.mxu1 }
  0xdc   : > { %v651_v9 = vpop.f32.mrf.mxu1 }
  0xdd   : > { %v652_v16 = vadd.f32 %v1714_v14, %v651_v9 }
  0xde   : > { %v1795_v10 = vpop.f32.mrf.mxu1 }
  0xdf   : > { %v721_v22 = vpack.c.bf16 %v652_v16, %v649_v19 }
  0xe0   : > { %v715_v12 = vpop.f32.mrf.mxu1 }
  0xe1   : > { %v716_v13 = vadd.f32 %v1719_v11, %v715_v12 }
  0xe2   : > { %v1802_v15 = vpop.f32.mrf.mxu1 }
  0xe3   : > { %v2223_v17 = vpack.c.bf16 %v716_v13, %v716_v13 }
  0xe4   : > { %v718_v18 = vpop.f32.mrf.mxu1 }
  0xe5   : > { %975 = vrot.lane.b32.xlu1 %v2223_v17, %s2047_s22  ;;  %850 = vrot.lane.b32.xlu0 %v2223_v17, %s2048_s17  ;;  %v728_v20 = vsel %vm723_vm2, %v2223_v17, 0 }
  0xe6   : > { %v1803_v21 = vpop.f32.mrf.mxu1  ;;  %1805 = vmatpush3.bf16.xpose.msra.mxu0 %v728_v20 }
  0xe7   : > { %1816 = vmatprep.subr.bf16.mxu0 %v2045_v1 }
  0xe9   : > { %973 = vrot.lane.b32.xlu1 %v721_v22, %s2047_s22  ;;  %848 = vrot.lane.b32.xlu0 %v721_v22, %s2048_s17  ;;  %s2054_s22 = smov 8  }
  0xed   : > { %1098 = vrot.lane.b32.xlu1 %v721_v22, %s2049_s28  ;;  %1100 = vrot.lane.b32.xlu0 %v2223_v17, %s2049_s28 }
  0xee   : > { %1807 = vmatmul.mubr.msk.bf16.vlgmr.msra.gmra.mxu0 %vm723_vm2, %v721_v22 }
  0xef   : > { %1818 = vmatprep.mubr.msk.bf16.mxu0 %vm2046_vm0, %v2045_v1 }
 0x157   : > { %v851_v23 = vpop.permute.xlu0 %850  ;;  %v976_v25 = vpop.permute.xlu1 %975 }
 0x158   : > { %v856_v24 = vsel %vm723_vm2, %v851_v23, 0  ;;  %v981_v27 = vsel %vm723_vm2, %v976_v25, 0 }
 0x159   : > { %1817 = vmatpush3.bf16.xpose.msra.mxu0 %v856_v24 }
 0x15a   : > { %1828 = vmatprep.subr.bf16.mxu0 %v2045_v1 }
 0x15b   : > { %v849_v26 = vpop.permute.xlu0 %848  ;;  %v974_v29 = vpop.permute.xlu1 %973 }
 0x15f   : > { %v1101_v28 = vpop.permute.xlu0 %1100  ;;  %v1099_v31 = vpop.permute.xlu1 %1098 }
 0x160   : > { %1819 = vmatmul.mubr.msk.bf16.vlgmr.msra.gmra.mxu0 %vm723_vm2, %v849_v26  ;;  %v1106_v30 = vsel %vm723_vm2, %v1101_v28, 0 }
 0x161   : > { %1829 = vmatpush3.bf16.xpose.msra.mxu0 %v981_v27  ;;  %1830 = vmatprep.mubr.msk.bf16.mxu0 %vm2046_vm0, %v2045_v1 }
 0x162   : > { %1840 = vmatprep.subr.bf16.mxu0 %v2045_v1 }
 0x168   : > { %1831 = vmatmul.mubr.msk.bf16.vlgmr.msra.gmra.mxu0 %vm723_vm2, %v974_v29 }
 0x169   : > { %1841 = vmatpush3.bf16.xpose.msra.mxu0 %v1106_v30  ;;  %1842 = vmatprep.mubr.msk.bf16.mxu0 %vm2046_vm0, %v2045_v1 }
 0x16a   : > { %1852 = vmatprep.subr.bf16.mxu0 %v2045_v1 }
 0x170   : > { %1843 = vmatmul.mubr.msk.bf16.vlgmr.msra.gmra.mxu0 %vm723_vm2, %v1099_v31 }
 0x171   : > { %1856 = vmatprep.mubr.msk.bf16.mxu0 %vm2046_vm0, %v2045_v1 }
 0x1ae   : > { %v764_v32 = vpop.f32.mrf.mxu0 }
 0x1af   : > { %v771_v33 = vmul.f32 0.35355338, %v764_v32 }
 0x1b0   : > { %v1808_v34 = vpop.f32.mrf.mxu0 }
 0x1b1   : > { %v773_v35 = vsel %vm723_vm2, %v771_v33, -inf }
 0x1b2   : > { %774 = vmax.xlane.f32.xlu0 %v773_v35  ;;  %v767_v36 = vpop.f32.mrf.mxu0 }
 0x1b3   : > { %v772_v37 = vmul.f32 0.35355338, %v767_v36 }
 0x1b4   : > { %v1809_v38 = vpop.f32.mrf.mxu0 }
 0x1b5   : > { %v776_v39 = vsel %vm723_vm2, %v772_v37, -inf }
 0x1b6   : > { %777 = vmax.xlane.f32.xlu1 %v776_v39 }
 0x220   : > { %v892_v40 = vpop.f32.mrf.mxu0 }
 0x221   : > { %v899_v41 = vmul.f32 0.35355338, %v892_v40 }
 0x222   : > { %v1820_v42 = vpop.f32.mrf.mxu0 }
 0x223   : > { %v901_v43 = vsel %vm723_vm2, %v899_v41, -inf }
 0x224   : > { %902 = vmax.xlane.f32.xlu0 %v901_v43  ;;  %v895_v44 = vpop.f32.mrf.mxu0 }
 0x225   : > { %v900_v45 = vmul.f32 0.35355338, %v895_v44 }
 0x226   : > { %v1821_v46 = vpop.f32.mrf.mxu0 }
 0x227   : > { %v904_v47 = vsel %vm723_vm2, %v900_v45, -inf }
 0x228   : > { %905 = vmax.xlane.f32.xlu0 %v904_v47  ;;  %v1017_v48 = vpop.f32.mrf.mxu0 }
 0x229   : > { %v1024_v49 = vmul.f32 0.35355338, %v1017_v48 }
 0x22a   : > { %v1832_v50 = vpop.f32.mrf.mxu0 }
 0x22b   : > { %v1026_v51 = vsel %vm723_vm2, %v1024_v49, -inf }
 0x22c   : > { %1027 = vmax.xlane.f32.xlu1 %v1026_v51  ;;  %v1020_v52 = vpop.f32.mrf.mxu0 }
 0x22d   : > { %v1025_v53 = vmul.f32 0.35355338, %v1020_v52 }
 0x22e   : > { %v1833_v54 = vpop.f32.mrf.mxu0 }
 0x22f   : > { %v1029_v55 = vsel %vm723_vm2, %v1025_v53, -inf }
 0x230   : > { %1030 = vmax.xlane.f32.xlu0 %v1029_v55  ;;  %v1142_v56 = vpop.f32.mrf.mxu0 }
 0x231   : > { %v1149_v57 = vmul.f32 0.35355338, %v1142_v56 }
 0x232   : > { %v1844_v58 = vpop.f32.mrf.mxu0 }
 0x233   : > { %v1151_v59 = vsel %vm723_vm2, %v1149_v57, -inf }
 0x234   : > { %1152 = vmax.xlane.f32.xlu1 %v1151_v59  ;;  %v1145_v60 = vpop.f32.mrf.mxu0 }
 0x235   : > { %v1150_v61 = vmul.f32 0.35355338, %v1145_v60 }
 0x236   : > { %v1845_v62 = vpop.f32.mrf.mxu0 }
 0x237   : > { %v1154_v63 = vsel %vm723_vm2, %v1150_v61, -inf }
 0x238   : > { %1155 = vmax.xlane.f32.xlu0 %v1154_v63 }
 0x23b   : > { %v775_v5 = vpop.xlane.xlu0 %774 }
 0x23c   : > { %v779_v6 = vsub.f32 %v771_v33, %v775_v5 }
 0x23e   : > { %v781_v9 = vmul.f32 1.442695, %v779_v6 }
 0x23f   : > { %v778_v0 = vpop.xlane.xlu1 %777 }
 0x240   : > { %v780_v2 = vsub.f32 %v772_v37, %v778_v0 }
 0x242   : > { %v783_v3 = vmul.f32 1.442695, %v780_v2 }
 0x244   : > { %1961 = vpow2.f32 %v783_v3 }
 0x245   : > { %797 = vrot.lane.b32.xlu1 %v2223_v17, %s2050_s21  ;;  %1963 = vpow2.f32 %v781_v9  ;;  %s2055_s21 = smov 16  }
 0x251   : > { %v2258_v7 = vpop.eup %1961 }
 0x252   : > { %v788_v8 = vsel %vm723_vm2, %v2258_v7, 0.0  ;;  %v1964_v10 = vpop.eup %1963 }
 0x253   : > { %789 = vadd.xlane.f32.xlu0 %v788_v8  ;;  %v785_v11 = vsel %vm723_vm2, %v1964_v10, 0.0 }
 0x269   : > { %786 = vadd.xlane.f32.xlu1 %v785_v11 }
 0x2ad   : > { %v903_v12 = vpop.xlane.xlu0 %902 }
 0x2ae   : > { %v907_v13 = vsub.f32 %v899_v41, %v903_v12 }
 0x2b0   : > { %v909_v14 = vmul.f32 1.442695, %v907_v13 }
 0x2b1   : > { %v906_v15 = vpop.xlane.xlu0 %905 }
 0x2b2   : > { %1965 = vpow2.f32 %v909_v14  ;;  %v908_v16 = vsub.f32 %v900_v45, %v906_v15 }
 0x2b4   : > { %v911_v18 = vmul.f32 1.442695, %v908_v16 }
 0x2b5   : > { %v1028_v19 = vpop.xlane.xlu1 %1027 }
 0x2b6   : > { %1967 = vpow2.f32 %v911_v18  ;;  %v1032_v20 = vsub.f32 %v1024_v49, %v1028_v19 }
 0x2b8   : > { %v1034_v21 = vmul.f32 1.442695, %v1032_v20 }
 0x2b9   : > { %v1031_v22 = vpop.xlane.xlu0 %1030 }
 0x2ba   : > { %1969 = vpow2.f32 %v1034_v21  ;;  %v1033_v23 = vsub.f32 %v1025_v53, %v1031_v22 }
 0x2bc   : > { %v1036_v24 = vmul.f32 1.442695, %v1033_v23 }
 0x2bd   : > { %v1153_v25 = vpop.xlane.xlu1 %1152 }
 0x2be   : > { %1971 = vpow2.f32 %v1036_v24  ;;  %v1157_v26 = vsub.f32 %v1149_v57, %v1153_v25  ;;  %v1952_v24 = vld [vmem:[%s2394_s6 + $0x8] sm:$0xff]  }
 0x2bf   : > { %v2263_v27 = vpop.eup %1965  ;;  %1853 = vmatpush3.bf16.msra.mxu0 %v1952_v24  ;;  %v1735_v24 = vld [vmem:[%s2396_s8] ss:$0 sm:$0xff] }
 0x2c0   : > { %v1159_v28 = vmul.f32 1.442695, %v1157_v26  ;;  %v913_v29 = vsel %vm723_vm2, %v2263_v27, 0.0  ;;  %1854 = vmatprep.subr.bf16.mxu0 %v2045_v1 }
 0x2c1   : > { %914 = vadd.xlane.f32.xlu1 %v913_v29  ;;  %v798_v30 = vpop.permute.xlu1 %797  ;;  %v1156_v31 = vpop.xlane.xlu0 %1155  ;;  %v1953_v29 = vld [vmem:[%s2394_s6] sm:$0xff]  }
 0x2c2   : > { %1973 = vpow2.f32 %v1159_v28  ;;  %v804_v32 = vsel %vm802_vm3, %v798_v30, 0  ;;  %v1158_v33 = vsub.f32 %v1150_v61, %v1156_v31 }
 0x2c3   : > { %v1968_v34 = vpop.eup %1967  ;;  %1811 = vmatpush3.bf16.msra.mxu1 %v804_v32  ;;  %1855 = vmatpush3.bf16.msra.mxu0 %v1953_v29 }
 0x2c4   : > { %v1161_v35 = vmul.f32 1.442695, %v1158_v33  ;;  %v916_v36 = vsel %vm723_vm2, %v1968_v34, 0.0  ;;  %1822 = vmatprep.subr.bf16.mxu1 %v2045_v1  ;;  %1868 = vmatprep.subr.bf16.mxu0 %v2045_v1 }
 0x2c5   : > { %917 = vadd.xlane.f32.xlu0 %v916_v36 }
 0x2c6   : > { %1975 = vpow2.f32 %v1161_v35 }
 0x2c7   : > { %v1970_v37 = vpop.eup %1969 }
 0x2c8   : > { %v1038_v38 = vsel %vm723_vm2, %v1970_v37, 0.0 }
 0x2c9   : > { %1039 = vadd.xlane.f32.xlu1 %v1038_v38 }
 0x2cb   : > { %v1972_v39 = vpop.eup %1971 }
 0x2cc   : > { %v1041_v40 = vsel %vm723_vm2, %v1972_v39, 0.0 }
 0x2cd   : > { %1042 = vadd.xlane.f32.xlu0 %v1041_v40 }
 0x2cf   : > { %v2272_v41 = vpop.eup %1973 }
 0x2d0   : > { %v1163_v42 = vsel %vm723_vm2, %v2272_v41, 0.0 }
 0x2d1   : > { %1164 = vadd.xlane.f32.xlu1 %v1163_v42 }
 0x2d3   : > { %v1976_v43 = vpop.eup %1975 }
 0x2d4   : > { %v1166_v44 = vsel %vm723_vm2, %v1976_v43, 0.0 }
 0x2d5   : > { %1167 = vadd.xlane.f32.xlu0 %v1166_v44 }
 0x2dc   : > { %v790_v45 = vpop.xlane.xlu0 %789 }
 0x2dd   : > { %1977 = vrcp.f32 %v790_v45 }
 0x2e2   : > { %1049 = vrot.lane.b32.xlu1 %v2223_v17, %s2051_s29  ;;  %s2056_s29 = smov 24  }
 0x2e6   : > { %1174 = vrot.lane.b32.xlu1 %v2223_v17, %s2052_s2 }
 0x2ea   : > { %v1978_v47 = vpop.eup %1977 }
 0x2eb   : > { %924 = vrot.lane.b32.xlu0 %v2223_v17, %s2053_s30  ;;  %v794_v50 = vmul.f32 %v1978_v47, %v2258_v7  ;;  %s576_s30 = scalar_lea.vmem %s2404_s16, %s1709_s20 }
 0x2f2   : > { %v787_v46 = vpop.xlane.xlu1 %786 }
 0x2f3   : > { %1979 = vrcp.f32 %v787_v46 }
 0x300   : > { %v1980_v48 = vpop.eup %1979 }
 0x301   : > { %v793_v49 = vmul.f32 %v1980_v48, %v1964_v10 }
 0x303   : > { %v795_v51 = vpack.c.bf16 %v794_v50, %v793_v49 }
 0x305   : > { %1813 = vmatmul.mubr.msk.bf16.vlgmr.msra.gmra.mxu1 %vm723_vm2, %v795_v51 }
 0x306   : > { %1824 = vmatprep.mubr.msk.bf16.mxu1 %vm2046_vm0, %v2045_v1 }
 0x34a   : > { %v915_v53 = vpop.xlane.xlu1 %914 }
 0x34e   : > { %v918_v52 = vpop.xlane.xlu0 %917 }
 0x34f   : > { %1981 = vrcp.f32 %v918_v52 }
 0x350   : > { %1983 = vrcp.f32 %v915_v53 }
 0x352   : > { %v1040_v54 = vpop.xlane.xlu1 %1039 }
 0x356   : > { %v1043_v17 = vpop.xlane.xlu0 %1042 }
 0x357   : > { %1985 = vrcp.f32 %v1043_v17  ;;  %v1731_v17 = vld [vmem:[%s2395_s7] ss:$0 sm:$0xff] }
 0x358   : > { %1987 = vrcp.f32 %v1040_v54  ;;  %v1323_v54 = vunpack.c.l.bf16 %v2200_v4 }
 0x35a   : > { %v1165_v56 = vpop.xlane.xlu1 %1164 }
 0x35c   : > { %v1982_v55 = vpop.eup %1981 }
 0x35d   : > { %v1984_v58 = vpop.eup %1983  ;;  %v922_v59 = vmul.f32 %v1982_v55, %v1968_v34 }
 0x35e   : > { %v1168_v57 = vpop.xlane.xlu0 %1167  ;;  %v921_v62 = vmul.f32 %v1984_v58, %v2263_v27  ;;  %v1050_v63 = vpop.permute.xlu1 %1049 }
 0x35f   : > { %1989 = vrcp.f32 %v1168_v57  ;;  %v1055_v3 = vsel %vm802_vm3, %v1050_v63, 0 }
 0x360   : > { %1991 = vrcp.f32 %v1165_v56  ;;  %v923_v0 = vpack.c.bf16 %v922_v59, %v921_v62  ;;  %v1324_v59 = vunpack.c.h.bf16 %v2200_v4 }
 0x362   : > { %v925_v60 = vpop.permute.xlu0 %924  ;;  %v1175_v8 = vpop.permute.xlu1 %1174 }
 0x363   : > { %v930_v61 = vsel %vm802_vm3, %v925_v60, 0  ;;  %v1180_v11 = vsel %vm802_vm3, %v1175_v8, 0 }
 0x364   : > { %1823 = vmatpush3.bf16.msra.mxu1 %v930_v61  ;;  %v1986_v2 = vpop.eup %1985 }
 0x365   : > { %1834 = vmatprep.subr.bf16.mxu1 %v2045_v1  ;;  %v1988_v5 = vpop.eup %1987  ;;  %v1047_v6 = vmul.f32 %v1986_v2, %v1972_v39 }
 0x366   : > { %v1046_v7 = vmul.f32 %v1988_v5, %v1970_v37 }
 0x367   : > { %1825 = vmatmul.mubr.msk.bf16.vlgmr.msra.gmra.mxu1 %vm723_vm2, %v923_v0 }
 0x368   : > { %1835 = vmatpush3.bf16.msra.mxu1 %v1055_v3  ;;  %1836 = vmatprep.mubr.msk.bf16.mxu1 %vm2046_vm0, %v2045_v1  ;;  %v1048_v9 = vpack.c.bf16 %v1047_v6, %v1046_v7 }
 0x369   : > { %1846 = vmatprep.subr.bf16.mxu1 %v2045_v1 }
 0x36c   : > { %v1990_v10 = vpop.eup %1989 }
 0x36d   : > { %v1992_v12 = vpop.eup %1991  ;;  %v1172_v13 = vmul.f32 %v1990_v10, %v1976_v43 }
 0x36e   : > { %v1171_v14 = vmul.f32 %v1992_v12, %v2272_v41 }
 0x36f   : > { %1837 = vmatmul.mubr.msk.bf16.vlgmr.msra.gmra.mxu1 %vm723_vm2, %v1048_v9 }
 0x370   : > { %1847 = vmatpush3.bf16.msra.mxu1 %v1180_v11  ;;  %1848 = vmatprep.mubr.msk.bf16.mxu1 %vm2046_vm0, %v2045_v1  ;;  %v1173_v15 = vpack.c.bf16 %v1172_v13, %v1171_v14  ;;  %v1954_v13 = vld [vmem:[%s2400_s12 + $0x8] sm:$0xff]   ;;  %v1955_v14 = vld [vmem:[%s2400_s12] sm:$0xff]  }
 0x371   : > { %1860 = vmatprep.subr.bf16.mxu1 %v2045_v1 }
 0x377   : > { %1849 = vmatmul.mubr.msk.bf16.vlgmr.msra.gmra.mxu1 %vm723_vm2, %v1173_v15 }
 0x378   : > { %1864 = vmatprep.mubr.msk.bf16.mxu1 %vm2046_vm0, %v2045_v1  ;;  %1861 = vmatpush3.bf16.msra.mxu1 %v1954_v13 }
 0x379   : > { %1862 = vmatprep.subr.bf16.mxu1 %v2045_v1 }
 0x37c   : > { %1863 = vmatpush3.bf16.msra.mxu1 %v1955_v14 }
 0x3c5   : > { %v840_v16 = vpop.f32.mrf.mxu1 }
 0x3c7   : > { %v1814_v18 = vpop.f32.mrf.mxu1 }
 0x3c9   : > { %v843_v19 = vpop.f32.mrf.mxu1 }
 0x3cb   : > { %v1815_v20 = vpop.f32.mrf.mxu1 }
 0x427   : > { %v966_v21 = vpop.f32.mrf.mxu1 }
 0x429   : > { %v1826_v22 = vpop.f32.mrf.mxu1 }
 0x42b   : > { %v969_v23 = vpop.f32.mrf.mxu1 }
 0x42c   : > { %v1932_v25 = vpack.i.bf16 %v969_v23, %v966_v21 }
 0x42d   : > { %v1827_v26 = vpop.f32.mrf.mxu1 }
 0x42e   : > { %1933 = vrot.lane.b32.xlu0 %v1932_v25, %s2054_s22 }
 0x42f   : > { %v1091_v27 = vpop.f32.mrf.mxu1 }
 0x431   : > { %v1838_v28 = vpop.f32.mrf.mxu1 }
 0x432   : > { %v1736_v28 = vld [vmem:[%s2397_s9] ss:$0 sm:$0xff] }
 0x433   : > { %v1094_v30 = vpop.f32.mrf.mxu1 }
 0x434   : > { %v1937_v31 = vpack.i.bf16 %v1094_v30, %v1091_v27 }
 0x435   : > { %v1839_v32 = vpop.f32.mrf.mxu1 }
 0x436   : > { %1938 = vrot.lane.b32.xlu1 %v1937_v31, %s2055_s21 }
 0x437   : > { %v1216_v33 = vpop.f32.mrf.mxu1 }
 0x439   : > { %v1850_v34 = vpop.f32.mrf.mxu1 }
 0x43a   : > { %v1957_v34 = vld [vmem:[%s2402_s14 + $0x10] sm:$0xff]  }
 0x43b   : > { %v1219_v35 = vpop.f32.mrf.mxu1 }
 0x43c   : > { %v1942_v36 = vpack.i.bf16 %v1219_v35, %v1216_v33  ;;  %v1956_v33 = vld [vmem:[%s2402_s14 + $0x18] sm:$0xff]   ;;  %v1958_v35 = vld [vmem:[%s2402_s14 + $0x8] sm:$0xff]  }
 0x43d   : > { %v1851_v37 = vpop.f32.mrf.mxu1 }
 0x43e   : > { %1943 = vrot.lane.b32.xlu0 %v1942_v36, %s2056_s29  ;;  %v1959_v36 = vld [vmem:[%s2402_s14] sm:$0xff]  }
 0x43f   : > { %v1737_v37 = vld [vmem:[%s2401_s13] ss:$0 sm:$0xff] }
 0x4a0   : > { %v1934_v38 = vpop.permute.xlu0 %1933 }
 0x4a1   : > { %v1936_v40 = vunpack.i.h.bf16 %v1934_v38  ;;  %v1935_v41 = vunpack.i.l.bf16 %v1934_v38 }
 0x4a3   : > { %v1248_v45 = vsel %vm723_vm2, %v843_v19, %v1936_v40  ;;  %v1247_v46 = vsel %vm723_vm2, %v840_v16, %v1935_v41 }
 0x4a8   : > { %v1939_v39 = vpop.permute.xlu1 %1938 }
 0x4a9   : > { %v1941_v42 = vunpack.i.h.bf16 %v1939_v39  ;;  %v1940_v43 = vunpack.i.l.bf16 %v1939_v39 }
 0x4ab   : > { %v1251_v49 = vsel %vm1249_vm4, %v1248_v45, %v1941_v42  ;;  %v1250_v50 = vsel %vm1249_vm4, %v1247_v46, %v1940_v43 }
 0x4b0   : > { %v1944_v44 = vpop.permute.xlu0 %1943 }
 0x4b1   : > { %v1946_v47 = vunpack.i.h.bf16 %v1944_v44  ;;  %v1945_v48 = vunpack.i.l.bf16 %v1944_v44 }
 0x4b3   : > { %v1254_v51 = vsel %vm1252_vm5, %v1251_v49, %v1946_v47  ;;  %v1253_v52 = vsel %vm1252_vm5, %v1250_v50, %v1945_v48 }
 0x4b4   : > { %v1255_v53 = vpack.c.bf16 %v1254_v51, %v1253_v52 }
 0x4b6   : > { %1857 = vmatmul.mubr.msk.bf16.vlgmr.msra.gmra.mxu0 %vm610_vm1, %v1255_v53 }
 0x4b7   : > { %1876 = vmatprep.mubr.msk.bf16.mxu0 %vm2046_vm0, %v2045_v1  ;;  %1869 = vmatpush3.bf16.msra.mxu0 %v1956_v33 }
 0x4b8   : > { %1870 = vmatprep.subr.bf16.mxu0 %v2045_v1 }
 0x4bb   : > { %1871 = vmatpush3.bf16.msra.mxu0 %v1957_v34 }
 0x4bc   : > { %1872 = vmatprep.subr.bf16.mxu0 %v2045_v1 }
 0x4bf   : > { %1873 = vmatpush3.bf16.msra.mxu0 %v1958_v35 }
 0x4c0   : > { %1874 = vmatprep.subr.bf16.mxu0 %v2045_v1 }
 0x4c3   : > { %1875 = vmatpush3.bf16.msra.mxu0 %v1959_v36 }
 0x576   : > { %v1316_v55 = vpop.f32.mrf.mxu0 }
 0x577   : > { %v1317_v56 = vadd.f32 %v1731_v17, %v1316_v55 }
 0x578   : > { %v1858_v57 = vpop.f32.mrf.mxu0 }
 0x579   : > { %v1325_v58 = vadd.f32 %v1323_v54, %v1317_v56 }
 0x57a   : > { %v1319_v60 = vpop.f32.mrf.mxu0 }
 0x57b   : > { %v1320_v61 = vadd.f32 %v1731_v17, %v1319_v60  ;;  %v1327_v62 = vsel %vm610_vm1, %v1325_v58, 0.0 }
 0x57c   : > { %1328 = vadd.xlane.f32.xlu1 %v1327_v62  ;;  %v1859_v63 = vpop.f32.mrf.mxu0 }
 0x57d   : > { %v1326_v0 = vadd.f32 %v1324_v59, %v1320_v61  ;;  %v1741_v61 = vld [vmem:[%s2403_s15] ss:$0 sm:$0xff] }
 0x57f   : > { %v1330_v2 = vsel %vm610_vm1, %v1326_v0, 0.0 }
 0x580   : > { %1331 = vadd.xlane.f32.xlu0 %v1330_v2 }
 0x605   : > { %v1329_v3 = vpop.xlane.xlu1 %1328 }
 0x606   : > { %v1334_v5 = vmul.f32 0.03125, %v1329_v3 }
 0x608   : > { %v1336_v6 = vsub.f32 %v1325_v58, %v1334_v5 }
 0x609   : > { %v1332_v7 = vpop.xlane.xlu0 %1331 }
 0x60a   : > { %v1335_v8 = vmul.f32 0.03125, %v1332_v7  ;;  %v1338_v9 = vmul.f32 %v1336_v6, %v1336_v6 }
 0x60c   : > { %v1337_v10 = vsub.f32 %v1326_v0, %v1335_v8  ;;  %v1340_v11 = vsel %vm610_vm1, %v1338_v9, 0.0 }
 0x60d   : > { %1341 = vadd.xlane.f32.xlu0 %v1340_v11 }
 0x60e   : > { %v1339_v4 = vmul.f32 %v1337_v10, %v1337_v10 }
 0x610   : > { %v1343_v12 = vsel %vm610_vm1, %v1339_v4, 0.0 }
 0x611   : > { %1344 = vadd.xlane.f32.xlu1 %v1343_v12 }
 0x696   : > { %v1342_v15 = vpop.xlane.xlu0 %1341 }
 0x697   : > { %v1346_v16 = vmul.f32 0.03125, %v1342_v15 }
 0x699   : > { %v1348_v18 = vadd.f32 1e-05, %v1346_v16 }
 0x69a   : > { %v1345_v19 = vpop.xlane.xlu1 %1344 }
 0x69b   : > { %1993 = vrsqrt.f32 %v1348_v18  ;;  %v1347_v20 = vmul.f32 0.03125, %v1345_v19 }
 0x69d   : > { %v1349_v21 = vadd.f32 1e-05, %v1347_v20 }
 0x69f   : > { %1995 = vrsqrt.f32 %v1349_v21 }
 0x6a8   : > { %v1994_v22 = vpop.eup %1993 }
 0x6a9   : > { %v1352_v23 = vmul.f32 %v1994_v22, %v1336_v6 }
 0x6ab   : > { %v1361_v27 = vmul.f32 %v1735_v24, %v1352_v23 }
 0x6ac   : > { %v1996_v25 = vpop.eup %1995 }
 0x6ad   : > { %v1353_v26 = vmul.f32 %v1996_v25, %v1337_v10  ;;  %v1370_v30 = vadd.f32 %v1736_v28, %v1361_v27  ;;  %v1747_v27 = vld [vmem:[%s2398_s10] ss:$0 sm:$0xff] }
 0x6af   : > { %v1362_v29 = vmul.f32 %v1735_v24, %v1353_v26 }
 0x6b1   : > { %v1371_v31 = vadd.f32 %v1736_v28, %v1362_v29  ;;  %v1748_v29 = vld [vmem:[%s2399_s11] ss:$0 sm:$0xff] }
 0x6b3   : > { %v1372_v32 = vpack.c.bf16 %v1371_v31, %v1370_v30 }
 0x6b5   : > { %1865 = vmatmul.mubr.msk.bf16.vlgmr.msra.gmra.mxu1 %vm610_vm1, %v1372_v32 }
 0x775   : > { %v1433_v38 = vpop.f32.mrf.mxu1 }
 0x776   : > { %v1434_v39 = vadd.f32 %v1737_v37, %v1433_v38 }
 0x777   : > { %v1866_v40 = vpop.f32.mrf.mxu1 }
 0x778   : > { %v1440_v41 = vmul.f32 %v1434_v39, %v1434_v39 }
 0x779   : > { %v1436_v42 = vpop.f32.mrf.mxu1 }
 0x77a   : > { %v1442_v43 = vmul.f32 %v1440_v41, %v1434_v39  ;;  %v1437_v44 = vadd.f32 %v1737_v37, %v1436_v42 }
 0x77b   : > { %v1867_v45 = vpop.f32.mrf.mxu1 }
 0x77c   : > { %v1444_v46 = vmul.f32 0.044715, %v1442_v43  ;;  %v1441_v47 = vmul.f32 %v1437_v44, %v1437_v44 }
 0x77e   : > { %v1446_v1 = vadd.f32 %v1444_v46, %v1434_v39  ;;  %v1443_v48 = vmul.f32 %v1441_v47, %v1437_v44 }
 0x780   : > { %v1448_v49 = vmul.f32 0.7978846, %v1446_v1  ;;  %v1445_v50 = vmul.f32 0.044715, %v1443_v48 }
 0x782   : > { %1997 = vtanh.f32 %v1448_v49  ;;  %v1447_v51 = vadd.f32 %v1445_v50, %v1437_v44 }
 0x784   : > { %v1449_v52 = vmul.f32 0.7978846, %v1447_v51 }
 0x786   : > { %1999 = vtanh.f32 %v1449_v52 }
 0x78f   : > { %v1998_v53 = vpop.eup %1997 }
 0x790   : > { %v1452_v17 = vadd.f32 1.0, %v1998_v53 }
 0x792   : > { %v1454_v55 = vmul.f32 0.5, %v1452_v17 }
 0x793   : > { %v2000_v54 = vpop.eup %1999 }
 0x794   : > { %v1453_v56 = vadd.f32 1.0, %v2000_v54  ;;  %v1456_v58 = vmul.f32 %v1454_v55, %v1434_v39 }
 0x796   : > { %v1455_v57 = vmul.f32 0.5, %v1453_v56 }
 0x798   : > { %v1457_v59 = vmul.f32 %v1455_v57, %v1437_v44 }
 0x79a   : > { %v1458_v60 = vpack.c.bf16 %v1457_v59, %v1456_v58 }
 0x79c   : > { %1877 = vmatmul.mubr.msk.bf16.vlgmr.msra.gmra.mxu0 %vm1498_vm6, %v1458_v60 }
 0x85c   : > { %v1536_v62 = vpop.f32.mrf.mxu0 }
 0x85d   : > { %v1537_v63 = vadd.f32 %v1741_v61, %v1536_v62 }
 0x85e   : > { %v1878_v0 = vpop.f32.mrf.mxu0 }
 0x85f   : > { %v1543_v2 = vadd.f32 %v1537_v63, %v1370_v30 }
 0x860   : > { %v1539_v3 = vpop.f32.mrf.mxu0 }
 0x861   : > { %v1540_v5 = vadd.f32 %v1741_v61, %v1539_v3  ;;  %v1545_v6 = vsel %vm610_vm1, %v1543_v2, 0.0 }
 0x862   : > { %1546 = vadd.xlane.f32.xlu0 %v1545_v6  ;;  %v1879_v7 = vpop.f32.mrf.mxu0 }
 0x863   : > { %v1544_v8 = vadd.f32 %v1540_v5, %v1371_v31 }
 0x865   : > { %v1548_v9 = vsel %vm610_vm1, %v1544_v8, 0.0 }
 0x866   : > { %1549 = vadd.xlane.f32.xlu1 %v1548_v9 }
 0x8eb   : > { %v1547_v10 = vpop.xlane.xlu0 %1546 }
 0x8ec   : > { %v1551_v11 = vmul.f32 0.03125, %v1547_v10 }
 0x8ee   : > { %v1553_v4 = vsub.f32 %v1543_v2, %v1551_v11 }
 0x8ef   : > { %v1550_v12 = vpop.xlane.xlu1 %1549 }
 0x8f0   : > { %v1552_v13 = vmul.f32 0.03125, %v1550_v12  ;;  %v1555_v14 = vmul.f32 %v1553_v4, %v1553_v4 }
 0x8f2   : > { %v1554_v15 = vsub.f32 %v1544_v8, %v1552_v13  ;;  %v1557_v16 = vsel %vm610_vm1, %v1555_v14, 0.0 }
 0x8f3   : > { %1558 = vadd.xlane.f32.xlu0 %v1557_v16 }
 0x8f4   : > { %v1556_v18 = vmul.f32 %v1554_v15, %v1554_v15 }
 0x8f6   : > { %v1560_v19 = vsel %vm610_vm1, %v1556_v18, 0.0 }
 0x8f7   : > { %1561 = vadd.xlane.f32.xlu1 %v1560_v19 }
 0x97c   : > { %v1559_v20 = vpop.xlane.xlu0 %1558 }
 0x97d   : > { %v1563_v21 = vmul.f32 0.03125, %v1559_v20 }
 0x97f   : > { %v1565_v22 = vadd.f32 1e-05, %v1563_v21 }
 0x980   : > { %v1562_v23 = vpop.xlane.xlu1 %1561 }
 0x981   : > { %2001 = vrsqrt.f32 %v1565_v22  ;;  %v1564_v24 = vmul.f32 0.03125, %v1562_v23 }
 0x983   : > { %v1566_v25 = vadd.f32 1e-05, %v1564_v24 }
 0x985   : > { %2003 = vrsqrt.f32 %v1566_v25 }
 0x98e   : > { %v2002_v26 = vpop.eup %2001 }
 0x98f   : > { %v1569_v28 = vmul.f32 %v2002_v26, %v1553_v4 }
 0x991   : > { %v1578_v30 = vmul.f32 %v1747_v27, %v1569_v28 }
 0x992   : > { %v2004_v31 = vpop.eup %2003 }
 0x993   : > { %v1587_v32 = vadd.f32 %v1748_v29, %v1578_v30  ;;  %v1570_v33 = vmul.f32 %v2004_v31, %v1554_v15 }
 0x995   : > { %v1753_v34 = vpack.c.bf16 %v1587_v32, %v1587_v32  ;;  %v1579_v35 = vmul.f32 %v1747_v27, %v1570_v33 }
 0x997   : > { %1598 = vst.msk [vmem:[%s576_s30] sm:$0xf] %vm1597_vm7, %v1753_v34  ;;  %v1588_v36 = vadd.f32 %v1748_v29, %v1579_v35 }
 0x999   : > { %v1754_v37 = vpack.c.bf16 %v1588_v36, %v1588_v36 }
 0x99b   : > { %1599 = vst.msk [vmem:[%s576_s30 + $0x4] sm:$0xf] %vm1597_vm7, %v1754_v37 }
 0x99c PF: > { %s26_s25 = sadd.s32 1, %s2043_s25   ;;  %s2409_s21 = smov %s2035_s23 }
 0x99d   : > { %p23_p7 = scmp.ge.s32.totalorder %s26_s25, 10   ;;  %s2410_s22 = smov %s2039_s24 }
 0x99e   : > { %s2411_s23 = smov %s2414_s26  ;;  %s2412_s24 = smov %s2418_s27 }
 0x99f   :  { %25 = sbr.rel (!%p23_p7) target bundleno = 4 (0x4), region = 117 }

</bundles_post_ra>
